<compile_context>
chip_gen: v7x
topology: tpu7x:2x2x1
jax: 0.10.0
libtpu: 0.0.40
codegen_flags: <defaults>
</compile_context>

<pallas_src>
import functools

import jax
import jax.numpy as jnp
from jax.experimental import pallas as pl
from jax.experimental.pallas import tpu as pltpu


def cvae_kernel(
    x_ref, c_ref, eps_ref,
    we1x_ref, we1c_ref, be1_ref,
    wml_ref, bml_ref,
    wd1z_ref, wd1c_ref, bd1_ref,
    wd2_ref, bd2_ref,
    rs_ref, kl_ref,
    *, set_size, latent, n_valid_rows, masked,
):
    i = pl.program_id(0)

    x = x_ref[...]            # (T, Din)  f32
    c = c_ref[0]              # (spt, C)  f32  (sets covered by this tile)
    eps = eps_ref[...]        # (T, L)    f32

    T = x.shape[0]
    spt = c.shape[0]
    He = we1x_ref.shape[1]
    Hd = wd1z_ref.shape[1]

    bf16 = jnp.bfloat16
    f32 = jnp.float32

    xb = x.astype(bf16)
    cb = c.astype(bf16)

    # ---------------- encoder: mu, logvar = encode(x, c) ----------------
    hx = jnp.dot(xb, we1x_ref[...], preferred_element_type=f32)        # (T, He)
    hc = jnp.dot(cb, we1c_ref[...], preferred_element_type=f32)        # (spt, He)
    # broadcast per-set context contribution across the set members
    h = hx.reshape(spt, set_size, He) + hc[:, None, :] + be1_ref[...]
    h = jnp.maximum(h, 0.0).reshape(T, He)                             # ReLU

    # fused [mu | logvar] matmul
    ml = jnp.dot(h.astype(bf16), wml_ref[...], preferred_element_type=f32)
    ml = ml + bml_ref[...]                                             # (T, 2L)
    mu = ml[:, :latent]
    logvar = ml[:, latent:]

    # ---------------- reparameterize: z = mu + eps * exp(0.5*logvar) ----
    std = jnp.exp(0.5 * logvar)
    z = mu + eps * std

    # ---------------- decoder: recon = decode(z, c) ---------------------
    hz = jnp.dot(z.astype(bf16), wd1z_ref[...], preferred_element_type=f32)
    hcd = jnp.dot(cb, wd1c_ref[...], preferred_element_type=f32)
    hd = hz.reshape(spt, set_size, Hd) + hcd[:, None, :] + bd1_ref[...]
    hd = jnp.maximum(hd, 0.0).reshape(T, Hd)                           # ReLU
    recon = jnp.dot(hd.astype(bf16), wd2_ref[...], preferred_element_type=f32)
    recon = recon + bd2_ref[...]                                       # (T, Din)

    # ---------------- per-tile partial loss sums -------------------------
    diff = recon - x
    sq = diff * diff
    var = std * std                     # == exp(logvar), saves a second exp stream
    kl_t = 1.0 + logvar - mu * mu - var

    if masked:  # ragged last tile: zero out padded rows
        rows = jax.lax.broadcasted_iota(jnp.int32, (T, 1), 0) + i * T
        valid = rows < n_valid_rows
        sq = jnp.where(valid, sq, 0.0)
        kl_t = jnp.where(valid, kl_t, 0.0)

    rs_ref[...] = jnp.full((1, 1, 128), jnp.sum(sq), dtype=f32)
    kl_ref[...] = jnp.full((1, 1, 128), jnp.sum(kl_t), dtype=f32)


def cvae_forward(x, c, eps, params, *, beta=1.0, kl_anneal_steps=0,
                 kl_anneal_start=0.0, current_step=0, target_tile_rows=256):
    """Pallas CVAE forward.  Returns scalar loss (recon + kl_weight * kl)."""
    n_sets, set_size, seq_len, channels = x.shape
    N = n_sets * set_size
    d_in = seq_len * channels
    c_dim = c.shape[-1]
    latent = eps.shape[-1]
    H = params["we1x"].shape[1]

    x_flat = x.reshape(N, d_in).astype(jnp.float32)
    eps = eps.astype(jnp.float32)

    # ----- tiling: each tile covers whole sets (so c never gets row-repeated)
    spt = max(1, target_tile_rows // set_size)     # sets per tile
    spt = min(spt, n_sets)
    tile_rows = spt * set_size
    num_tiles = pl.cdiv(n_sets, spt)
    masked = (num_tiles * tile_rows) != N

    pad_sets = num_tiles * spt - n_sets
    c32 = c.astype(jnp.float32)
    if pad_sets:
        c32 = jnp.pad(c32, ((0, pad_sets), (0, 0)))
    c_tiles = c32.reshape(num_tiles, spt, c_dim)

    # ----- KL annealing weight (runtime value, applied OUTSIDE the kernel:
    # a changing current_step never forces a Mosaic recompile)
    if kl_anneal_steps == 0:
        kl_weight = jnp.float32(beta)
    else:
        alpha = jnp.clip(jnp.float32(current_step) / kl_anneal_steps, 0.0, 1.0)
        kl_weight = jnp.float32(beta) * (kl_anneal_start + (1.0 - kl_anneal_start) * alpha)

    weight_args = (
        params["we1x"], params["we1c"], params["be1"],
        params["w_mulv"], params["b_mulv"],
        params["wd1z"], params["wd1c"], params["bd1"],
        params["wd2"], params["bd2"],
    )

    def _resident(a):  # full-shape block, constant index map -> stays in VMEM
        nd = a.ndim
        return pl.BlockSpec(a.shape, lambda i, _nd=nd: (0,) * _nd)

    in_specs = [
        pl.BlockSpec((tile_rows, d_in), lambda i: (i, 0)),       # x tile
        pl.BlockSpec((1, spt, c_dim), lambda i: (i, 0, 0)),      # c tile (per-set)
        pl.BlockSpec((tile_rows, latent), lambda i: (i, 0)),     # eps tile
    ] + [_resident(a) for a in weight_args]

    out_shape = [
        jax.ShapeDtypeStruct((num_tiles, 1, 128), jnp.float32),  # recon SSE partials
        jax.ShapeDtypeStruct((num_tiles, 1, 128), jnp.float32),  # KL sum partials
    ]
    out_specs = [
        pl.BlockSpec((1, 1, 128), lambda i: (i, 0, 0)),
        pl.BlockSpec((1, 1, 128), lambda i: (i, 0, 0)),
    ]

    flops = 2 * N * (d_in * H + H * 2 * latent + latent * H + H * d_in) \
        + 4 * n_sets * c_dim * H
    transcendentals = N * latent
    bytes_accessed = (
        x_flat.size * 4 + eps.size * 4 + c_tiles.size * 4
        + sum(int(a.size) * a.dtype.itemsize for a in weight_args)
        + 2 * num_tiles * 128 * 4
    )

    kernel = functools.partial(
        cvae_kernel,
        set_size=set_size, latent=latent, n_valid_rows=N, masked=masked,
    )

    rs_parts, kl_parts = pl.pallas_call(
        kernel,
        grid=(num_tiles,),
        in_specs=in_specs,
        out_specs=out_specs,
        out_shape=out_shape,
        compiler_params=pltpu.CompilerParams(
            dimension_semantics=("parallel",),          # no cross-tile carry -> megacore OK
            vmem_limit_bytes=48 * 1024 * 1024,          # v7x-safe headroom
        ),
        cost_estimate=pl.CostEstimate(
            flops=int(flops),
            transcendentals=int(transcendentals),
            bytes_accessed=int(bytes_accessed),
        ),
    )(x_flat, c_tiles, eps, *weight_args)

    recon_loss = jnp.sum(rs_parts[:, 0, 0]) / (N * d_in)
    kl_loss = -0.5 * jnp.sum(kl_parts[:, 0, 0]) / (N * latent)
    return recon_loss + kl_weight * kl_loss


def make_params(key, d_in, c_dim, hidden, latent):
    """Deterministic synthetic encoder/decoder weights (bf16 matmul weights)."""
    ks = jax.random.split(key, 6)
    s = 0.1
    bf = jnp.bfloat16
    return {
        "we1x": (s * jax.random.normal(ks[0], (d_in, hidden), jnp.float32)).astype(bf),
        "we1c": (s * jax.random.normal(ks[1], (c_dim, hidden), jnp.float32)).astype(bf),
        "be1": jnp.zeros((1, hidden), jnp.float32),
        # fused [mu | logvar] projection
        "w_mulv": (s * jax.random.normal(ks[2], (hidden, 2 * latent), jnp.float32)).astype(bf),
        "b_mulv": jnp.zeros((1, 2 * latent), jnp.float32),
        "wd1z": (s * jax.random.normal(ks[3], (latent, hidden), jnp.float32)).astype(bf),
        "wd1c": (s * jax.random.normal(ks[4], (c_dim, hidden), jnp.float32)).astype(bf),
        "bd1": jnp.zeros((1, hidden), jnp.float32),
        "wd2": (s * jax.random.normal(ks[5], (hidden, d_in), jnp.float32)).astype(bf),
        "bd2": jnp.zeros((1, d_in), jnp.float32),
    }


def cvae_reference(x, c, eps, params, *, kl_weight=1.0):
    """Pure-JAX reference (same bf16-matmul / f32-accumulate math)."""
    n_sets, set_size, seq_len, channels = x.shape
    N = n_sets * set_size
    d_in = seq_len * channels
    latent = eps.shape[-1]
    bf, f32 = jnp.bfloat16, jnp.float32

    x_flat = x.reshape(N, d_in).astype(f32)
    c_rep = jnp.repeat(c.astype(f32), N // n_sets, axis=0)

    def mm(a, w):
        return jnp.dot(a.astype(bf), w, preferred_element_type=f32)

    h = jnp.maximum(mm(x_flat, params["we1x"]) + mm(c_rep, params["we1c"])
                    + params["be1"], 0.0)
    ml = mm(h, params["w_mulv"]) + params["b_mulv"]
    mu, logvar = ml[:, :latent], ml[:, latent:]
    std = jnp.exp(0.5 * logvar)
    z = mu + eps.astype(f32) * std
    hd = jnp.maximum(mm(z, params["wd1z"]) + mm(c_rep, params["wd1c"])
                     + params["bd1"], 0.0)
    recon = mm(hd, params["wd2"]) + params["bd2"]
    recon_loss = jnp.mean((recon - x_flat) ** 2)
    kl_loss = -0.5 * jnp.mean(1.0 + logvar - mu * mu - jnp.exp(logvar))
    return recon_loss + kl_weight * kl_loss


if __name__ == "__main__":
    # small shapes consistent with the module's forward (dict input case)
    n_sets, set_size, seq_len, channels = 2, 128, 16, 8   # x: [2, 128, 16, 8]
    c_dim, hidden, latent = 16, 256, 128
    N = n_sets * set_size
    d_in = seq_len * channels

    key = jax.random.PRNGKey(0)
    kx, kc, keps, kp = jax.random.split(key, 4)
    x = jax.random.normal(kx, (n_sets, set_size, seq_len, channels), jnp.float32)
    c = jax.random.normal(kc, (n_sets, c_dim), jnp.float32)
    # eps ~ N(0,1) for the reparameterization trick (torch.randn_like analogue)
    eps = jax.random.normal(keps, (N, latent), jnp.float32)
    params = make_params(kp, d_in, c_dim, hidden, latent)

    loss = cvae_forward(x, c, eps, params, beta=1.0, kl_anneal_steps=0,
                        target_tile_rows=128)   # -> grid of 2 tiles
    loss = jax.block_until_ready(loss)

    ref = cvae_reference(x, c, eps, params, kl_weight=1.0)
    assert jnp.isfinite(loss), "loss is not finite"
    assert jnp.allclose(loss, ref, rtol=5e-3, atol=1e-3), (loss, ref)

    print("KERNEL_OK")
</pallas_src>

<mosaic_0001>
module attributes {stable_mosaic.version = 11 : i64} {
  func.func @cvae_kernel(%arg0: i32, %arg1: memref<128x128xf32, #tpu.memory_space<vmem>>, %arg2: memref<1x1x16xf32, #tpu.memory_space<vmem>>, %arg3: memref<128x128xf32, #tpu.memory_space<vmem>>, %arg4: memref<128x256xbf16, #tpu.memory_space<vmem>>, %arg5: memref<16x256xbf16, #tpu.memory_space<vmem>>, %arg6: memref<1x256xf32, #tpu.memory_space<vmem>>, %arg7: memref<256x256xbf16, #tpu.memory_space<vmem>>, %arg8: memref<1x256xf32, #tpu.memory_space<vmem>>, %arg9: memref<128x256xbf16, #tpu.memory_space<vmem>>, %arg10: memref<16x256xbf16, #tpu.memory_space<vmem>>, %arg11: memref<1x256xf32, #tpu.memory_space<vmem>>, %arg12: memref<256x128xbf16, #tpu.memory_space<vmem>>, %arg13: memref<1x128xf32, #tpu.memory_space<vmem>>, %arg14: memref<1x1x128xf32, #tpu.memory_space<vmem>>, %arg15: memref<1x1x128xf32, #tpu.memory_space<vmem>>) attributes {dimension_semantics = [#tpu.dimension_semantics<parallel>], iteration_bounds = array<i64: 2>, scalar_prefetch = 0 : i64, scratch_operands = 0 : i64, tpu.core_type = #tpu.core_type<tc>, window_params = [{transform_indices = @transform_0, window_bounds = array<i64: 128, 128>}, {transform_indices = @transform_1, window_bounds = array<i64: 1, 1, 16>}, {transform_indices = @transform_2, window_bounds = array<i64: 128, 128>}, {pipeline_mode = #tpu.pipeline_mode<synchronous>, transform_indices = @transform_3, window_bounds = array<i64: 128, 256>}, {pipeline_mode = #tpu.pipeline_mode<synchronous>, transform_indices = @transform_4, window_bounds = array<i64: 16, 256>}, {pipeline_mode = #tpu.pipeline_mode<synchronous>, transform_indices = @transform_5, window_bounds = array<i64: 1, 256>}, {pipeline_mode = #tpu.pipeline_mode<synchronous>, transform_indices = @transform_6, window_bounds = array<i64: 256, 256>}, {pipeline_mode = #tpu.pipeline_mode<synchronous>, transform_indices = @transform_7, window_bounds = array<i64: 1, 256>}, {pipeline_mode = #tpu.pipeline_mode<synchronous>, transform_indices = @transform_8, window_bounds = array<i64: 128, 256>}, {pipeline_mode = #tpu.pipeline_mode<synchronous>, transform_indices = @transform_9, window_bounds = array<i64: 16, 256>}, {pipeline_mode = #tpu.pipeline_mode<synchronous>, transform_indices = @transform_10, window_bounds = array<i64: 1, 256>}, {pipeline_mode = #tpu.pipeline_mode<synchronous>, transform_indices = @transform_11, window_bounds = array<i64: 256, 128>}, {pipeline_mode = #tpu.pipeline_mode<synchronous>, transform_indices = @transform_12, window_bounds = array<i64: 1, 128>}, {transform_indices = @transform_13, window_bounds = array<i64: 1, 1, 128>}, {transform_indices = @transform_14, window_bounds = array<i64: 1, 1, 128>}]} {
    %c0 = arith.constant 0 : index
    %c0_0 = arith.constant 0 : index
    %0 = vector.load %arg1[%c0, %c0_0] : memref<128x128xf32, #tpu.memory_space<vmem>>, vector<128x128xf32>
    %c0_1 = arith.constant 0 : index
    %c0_2 = arith.constant 0 : index
    %c0_3 = arith.constant 0 : index
    %1 = vector.load %arg2[%c0_1, %c0_2, %c0_3] : memref<1x1x16xf32, #tpu.memory_space<vmem>>, vector<1x1x16xf32>
    %2 = vector.shape_cast %1 : vector<1x1x16xf32> to vector<1x16xf32>
    %c0_4 = arith.constant 0 : index
    %c0_5 = arith.constant 0 : index
    %3 = vector.load %arg3[%c0_4, %c0_5] : memref<128x128xf32, #tpu.memory_space<vmem>>, vector<128x128xf32>
    %4 = arith.truncf %0 : vector<128x128xf32> to vector<128x128xbf16>
    %5 = arith.truncf %2 : vector<1x16xf32> to vector<1x16xbf16>
    %c0_6 = arith.constant 0 : index
    %c0_7 = arith.constant 0 : index
    %6 = vector.load %arg4[%c0_6, %c0_7] : memref<128x256xbf16, #tpu.memory_space<vmem>>, vector<128x256xbf16>
    %cst = arith.constant dense<0.000000e+00> : vector<128x256xf32>
    %7 = tpu.matmul %4, %6, %cst {dimension_numbers = #tpu.dot_dimension_numbers<[1], [0], [0], [1], [0, 0, 1, 1], [], []>} : vector<128x128xbf16>, vector<128x256xbf16>, vector<128x256xf32> -> vector<128x256xf32>
    %c0_8 = arith.constant 0 : index
    %c0_9 = arith.constant 0 : index
    %8 = vector.load %arg5[%c0_8, %c0_9] : memref<16x256xbf16, #tpu.memory_space<vmem>>, vector<16x256xbf16>
    %cst_10 = arith.constant dense<0.000000e+00> : vector<1x256xf32>
    %9 = tpu.matmul %5, %8, %cst_10 {dimension_numbers = #tpu.dot_dimension_numbers<[1], [0], [0], [1], [0, 0, 1, 1], [], []>} : vector<1x16xbf16>, vector<16x256xbf16>, vector<1x256xf32> -> vector<1x256xf32>
    %10 = vector.shape_cast %7 : vector<128x256xf32> to vector<1x128x256xf32>
    %11 = vector.shape_cast %9 : vector<1x256xf32> to vector<1x1x256xf32>
    %12 = vector.broadcast %11 : vector<1x1x256xf32> to vector<1x128x256xf32>
    %13 = arith.addf %10, %12 : vector<1x128x256xf32>
    %c0_11 = arith.constant 0 : index
    %c0_12 = arith.constant 0 : index
    %14 = vector.load %arg6[%c0_11, %c0_12] : memref<1x256xf32, #tpu.memory_space<vmem>>, vector<1x256xf32>
    %15 = vector.shape_cast %14 : vector<1x256xf32> to vector<1x1x256xf32>
    %16 = vector.broadcast %15 : vector<1x1x256xf32> to vector<1x128x256xf32>
    %17 = arith.addf %13, %16 : vector<1x128x256xf32>
    %cst_13 = arith.constant 0.000000e+00 : f32
    %18 = vector.broadcast %cst_13 : f32 to vector<1x128x256xf32>
    %19 = arith.maximumf %17, %18 : vector<1x128x256xf32>
    %20 = vector.shape_cast %19 : vector<1x128x256xf32> to vector<128x256xf32>
    %21 = arith.truncf %20 : vector<128x256xf32> to vector<128x256xbf16>
    %c0_14 = arith.constant 0 : index
    %c0_15 = arith.constant 0 : index
    %22 = vector.load %arg7[%c0_14, %c0_15] : memref<256x256xbf16, #tpu.memory_space<vmem>>, vector<256x256xbf16>
    %cst_16 = arith.constant dense<0.000000e+00> : vector<128x256xf32>
    %23 = tpu.matmul %21, %22, %cst_16 {dimension_numbers = #tpu.dot_dimension_numbers<[1], [0], [0], [1], [0, 0, 1, 1], [], []>} : vector<128x256xbf16>, vector<256x256xbf16>, vector<128x256xf32> -> vector<128x256xf32>
    %c0_17 = arith.constant 0 : index
    %c0_18 = arith.constant 0 : index
    %24 = vector.load %arg8[%c0_17, %c0_18] : memref<1x256xf32, #tpu.memory_space<vmem>>, vector<1x256xf32>
    %25 = vector.broadcast %24 : vector<1x256xf32> to vector<128x256xf32>
    %26 = arith.addf %23, %25 : vector<128x256xf32>
    %27 = vector.extract_strided_slice %26 {offsets = [0, 0], sizes = [128, 128], strides = [1, 1]} : vector<128x256xf32> to vector<128x128xf32>
    %28 = vector.extract_strided_slice %26 {offsets = [0, 128], sizes = [128, 128], strides = [1, 1]} : vector<128x256xf32> to vector<128x128xf32>
    %cst_19 = arith.constant 5.000000e-01 : f32
    %29 = vector.broadcast %cst_19 : f32 to vector<128x128xf32>
    %30 = arith.mulf %29, %28 : vector<128x128xf32>
    %31 = math.exp %30 : vector<128x128xf32>
    %32 = arith.mulf %3, %31 : vector<128x128xf32>
    %33 = arith.addf %27, %32 : vector<128x128xf32>
    %34 = arith.truncf %33 : vector<128x128xf32> to vector<128x128xbf16>
    %c0_20 = arith.constant 0 : index
    %c0_21 = arith.constant 0 : index
    %35 = vector.load %arg9[%c0_20, %c0_21] : memref<128x256xbf16, #tpu.memory_space<vmem>>, vector<128x256xbf16>
    %cst_22 = arith.constant dense<0.000000e+00> : vector<128x256xf32>
    %36 = tpu.matmul %34, %35, %cst_22 {dimension_numbers = #tpu.dot_dimension_numbers<[1], [0], [0], [1], [0, 0, 1, 1], [], []>} : vector<128x128xbf16>, vector<128x256xbf16>, vector<128x256xf32> -> vector<128x256xf32>
    %c0_23 = arith.constant 0 : index
    %c0_24 = arith.constant 0 : index
    %37 = vector.load %arg10[%c0_23, %c0_24] : memref<16x256xbf16, #tpu.memory_space<vmem>>, vector<16x256xbf16>
    %cst_25 = arith.constant dense<0.000000e+00> : vector<1x256xf32>
    %38 = tpu.matmul %5, %37, %cst_25 {dimension_numbers = #tpu.dot_dimension_numbers<[1], [0], [0], [1], [0, 0, 1, 1], [], []>} : vector<1x16xbf16>, vector<16x256xbf16>, vector<1x256xf32> -> vector<1x256xf32>
    %39 = vector.shape_cast %36 : vector<128x256xf32> to vector<1x128x256xf32>
    %40 = vector.shape_cast %38 : vector<1x256xf32> to vector<1x1x256xf32>
    %41 = vector.broadcast %40 : vector<1x1x256xf32> to vector<1x128x256xf32>
    %42 = arith.addf %39, %41 : vector<1x128x256xf32>
    %c0_26 = arith.constant 0 : index
    %c0_27 = arith.constant 0 : index
    %43 = vector.load %arg11[%c0_26, %c0_27] : memref<1x256xf32, #tpu.memory_space<vmem>>, vector<1x256xf32>
    %44 = vector.shape_cast %43 : vector<1x256xf32> to vector<1x1x256xf32>
    %45 = vector.broadcast %44 : vector<1x1x256xf32> to vector<1x128x256xf32>
    %46 = arith.addf %42, %45 : vector<1x128x256xf32>
    %cst_28 = arith.constant 0.000000e+00 : f32
    %47 = vector.broadcast %cst_28 : f32 to vector<1x128x256xf32>
    %48 = arith.maximumf %46, %47 : vector<1x128x256xf32>
    %49 = vector.shape_cast %48 : vector<1x128x256xf32> to vector<128x256xf32>
    %50 = arith.truncf %49 : vector<128x256xf32> to vector<128x256xbf16>
    %c0_29 = arith.constant 0 : index
    %c0_30 = arith.constant 0 : index
    %51 = vector.load %arg12[%c0_29, %c0_30] : memref<256x128xbf16, #tpu.memory_space<vmem>>, vector<256x128xbf16>
    %cst_31 = arith.constant dense<0.000000e+00> : vector<128x128xf32>
    %52 = tpu.matmul %50, %51, %cst_31 {dimension_numbers = #tpu.dot_dimension_numbers<[1], [0], [0], [1], [0, 0, 1, 1], [], []>} : vector<128x256xbf16>, vector<256x128xbf16>, vector<128x128xf32> -> vector<128x128xf32>
    %c0_32 = arith.constant 0 : index
    %c0_33 = arith.constant 0 : index
    %53 = vector.load %arg13[%c0_32, %c0_33] : memref<1x128xf32, #tpu.memory_space<vmem>>, vector<1x128xf32>
    %54 = vector.broadcast %53 : vector<1x128xf32> to vector<128x128xf32>
    %55 = arith.addf %52, %54 : vector<128x128xf32>
    %56 = arith.subf %55, %0 : vector<128x128xf32>
    %57 = arith.mulf %56, %56 : vector<128x128xf32>
    %58 = arith.mulf %31, %31 : vector<128x128xf32>
    %cst_34 = arith.constant 1.000000e+00 : f32
    %59 = vector.broadcast %cst_34 : f32 to vector<128x128xf32>
    %60 = arith.addf %59, %28 : vector<128x128xf32>
    %61 = arith.mulf %27, %27 : vector<128x128xf32>
    %62 = arith.subf %60, %61 : vector<128x128xf32>
    %63 = arith.subf %62, %58 : vector<128x128xf32>
    %64 = vector.shape_cast %57 : vector<128x128xf32> to vector<1x128x128xf32>
    %cst_35 = arith.constant dense<0.000000e+00> : vector<1xf32>
    %65 = vector.multi_reduction <add>, %64, %cst_35 [1, 2] : vector<1x128x128xf32> to vector<1xf32>
    %66 = vector.shape_cast %65 : vector<1xf32> to vector<1x1x1xf32>
    %67 = vector.extract %66[0, 0, 0] : f32 from vector<1x1x1xf32>
    %68 = vector.broadcast %67 : f32 to vector<1x1x128xf32>
    %c0_36 = arith.constant 0 : index
    %c0_37 = arith.constant 0 : index
    %c0_38 = arith.constant 0 : index
    %69 = vector.load %arg14[%c0_36, %c0_37, %c0_38] : memref<1x1x128xf32, #tpu.memory_space<vmem>>, vector<1x1x128xf32>
    tpu.vector_store %arg14[%c0_36, %c0_37, %c0_38], %68 {strides = array<i32>} : memref<1x1x128xf32, #tpu.memory_space<vmem>>, vector<1x1x128xf32>,
    %70 = vector.shape_cast %63 : vector<128x128xf32> to vector<1x128x128xf32>
    %cst_39 = arith.constant dense<0.000000e+00> : vector<1xf32>
    %71 = vector.multi_reduction <add>, %70, %cst_39 [1, 2] : vector<1x128x128xf32> to vector<1xf32>
    %72 = vector.shape_cast %71 : vector<1xf32> to vector<1x1x1xf32>
    %73 = vector.extract %72[0, 0, 0] : f32 from vector<1x1x1xf32>
    %74 = vector.broadcast %73 : f32 to vector<1x1x128xf32>
    %c0_40 = arith.constant 0 : index
    %c0_41 = arith.constant 0 : index
    %c0_42 = arith.constant 0 : index
    %75 = vector.load %arg15[%c0_40, %c0_41, %c0_42] : memref<1x1x128xf32, #tpu.memory_space<vmem>>, vector<1x1x128xf32>
    tpu.vector_store %arg15[%c0_40, %c0_41, %c0_42], %74 {strides = array<i32>} : memref<1x1x128xf32, #tpu.memory_space<vmem>>, vector<1x1x128xf32>,
    return
  }
  func.func @transform_0(%arg0: i32) -> (i32, i32) {
    %c0_i32 = arith.constant 0 : i32
    %c0_i32_0 = arith.constant 0 : i32
    return %arg0, %c0_i32 : i32, i32
  }
  func.func @transform_1(%arg0: i32) -> (i32, i32, i32) {
    %c0_i32 = arith.constant 0 : i32
    %c0_i32_0 = arith.constant 0 : i32
    %c0_i32_1 = arith.constant 0 : i32
    return %arg0, %c0_i32, %c0_i32_0 : i32, i32, i32
  }
  func.func @transform_2(%arg0: i32) -> (i32, i32) {
    %c0_i32 = arith.constant 0 : i32
    %c0_i32_0 = arith.constant 0 : i32
    return %arg0, %c0_i32 : i32, i32
  }
  func.func @transform_3(%arg0: i32) -> (i32, i32) {
    %c0_i32 = arith.constant 0 : i32
    %c0_i32_0 = arith.constant 0 : i32
    %c0_i32_1 = arith.constant 0 : i32
    return %c0_i32, %c0_i32_0 : i32, i32
  }
  func.func @transform_4(%arg0: i32) -> (i32, i32) {
    %c0_i32 = arith.constant 0 : i32
    %c0_i32_0 = arith.constant 0 : i32
    %c0_i32_1 = arith.constant 0 : i32
    return %c0_i32, %c0_i32_0 : i32, i32
  }
  func.func @transform_5(%arg0: i32) -> (i32, i32) {
    %c0_i32 = arith.constant 0 : i32
    %c0_i32_0 = arith.constant 0 : i32
    %c0_i32_1 = arith.constant 0 : i32
    return %c0_i32, %c0_i32_0 : i32, i32
  }
  func.func @transform_6(%arg0: i32) -> (i32, i32) {
    %c0_i32 = arith.constant 0 : i32
    %c0_i32_0 = arith.constant 0 : i32
    %c0_i32_1 = arith.constant 0 : i32
    return %c0_i32, %c0_i32_0 : i32, i32
  }
  func.func @transform_7(%arg0: i32) -> (i32, i32) {
    %c0_i32 = arith.constant 0 : i32
    %c0_i32_0 = arith.constant 0 : i32
    %c0_i32_1 = arith.constant 0 : i32
    return %c0_i32, %c0_i32_0 : i32, i32
  }
  func.func @transform_8(%arg0: i32) -> (i32, i32) {
    %c0_i32 = arith.constant 0 : i32
    %c0_i32_0 = arith.constant 0 : i32
    %c0_i32_1 = arith.constant 0 : i32
    return %c0_i32, %c0_i32_0 : i32, i32
  }
  func.func @transform_9(%arg0: i32) -> (i32, i32) {
    %c0_i32 = arith.constant 0 : i32
    %c0_i32_0 = arith.constant 0 : i32
    %c0_i32_1 = arith.constant 0 : i32
    return %c0_i32, %c0_i32_0 : i32, i32
  }
  func.func @transform_10(%arg0: i32) -> (i32, i32) {
    %c0_i32 = arith.constant 0 : i32
    %c0_i32_0 = arith.constant 0 : i32
    %c0_i32_1 = arith.constant 0 : i32
    return %c0_i32, %c0_i32_0 : i32, i32
  }
  func.func @transform_11(%arg0: i32) -> (i32, i32) {
    %c0_i32 = arith.constant 0 : i32
    %c0_i32_0 = arith.constant 0 : i32
    %c0_i32_1 = arith.constant 0 : i32
    return %c0_i32, %c0_i32_0 : i32, i32
  }
  func.func @transform_12(%arg0: i32) -> (i32, i32) {
    %c0_i32 = arith.constant 0 : i32
    %c0_i32_0 = arith.constant 0 : i32
    %c0_i32_1 = arith.constant 0 : i32
    return %c0_i32, %c0_i32_0 : i32, i32
  }
  func.func @transform_13(%arg0: i32) -> (i32, i32, i32) {
    %c0_i32 = arith.constant 0 : i32
    %c0_i32_0 = arith.constant 0 : i32
    %c0_i32_1 = arith.constant 0 : i32
    return %arg0, %c0_i32, %c0_i32_0 : i32, i32, i32
  }
  func.func @transform_14(%arg0: i32) -> (i32, i32, i32) {
    %c0_i32 = arith.constant 0 : i32
    %c0_i32_0 = arith.constant 0 : i32
    %c0_i32_1 = arith.constant 0 : i32
    return %arg0, %c0_i32, %c0_i32_0 : i32, i32, i32
  }
}

</mosaic_0001>

<bundles_post_ra>
// kernel: tpu_custom_call.1
= control target key start
LH: loop header
LB: loop body
LE: loop exit
PB: predicated region body
PF: predicated region fallthrough
CT: control target
= control target key end

     0   :  { %s4283_s0 = inlined_call_operand.hbm [shape: f32[256,128], index: 0, kind: input, shape index: {}]   ;;  %s4284_s1 = inlined_call_operand.vmem [shape: f32[2,1,16], index: 1, kind: input, shape index: {}]   ;;  %s4285_s2 = inlined_call_operand.hbm [shape: f32[256,128], index: 2, kind: input, shape index: {}]   ;;  %s4286_s3 = inlined_call_operand.hbm [shape: bf16[128,256], index: 3, kind: input, shape index: {}]   ;;  %s4287_s4 = inlined_call_operand.hbm [shape: bf16[16,256], index: 4, kind: input, shape index: {}]   ;;  %s4288_s5 = inlined_call_operand.vmem [shape: f32[1,256], index: 5, kind: input, shape index: {}]   ;;  %s4289_s6 = inlined_call_operand.hbm [shape: bf16[256,256], index: 6, kind: input, shape index: {}]   ;;  %s4290_s7 = inlined_call_operand.vmem [shape: f32[1,256], index: 7, kind: input, shape index: {}]   ;;  %s4291_s8 = inlined_call_operand.hbm [shape: bf16[128,256], index: 8, kind: input, shape index: {}]   ;;  %s4292_s9 = inlined_call_operand.vmem [shape: bf16[16,256], index: 9, kind: input, shape index: {}]   ;;  %s4293_s10 = inlined_call_operand.vmem [shape: f32[1,256], index: 10, kind: input, shape index: {}]   ;;  %s4294_s11 = inlined_call_operand.hbm [shape: bf16[256,128], index: 11, kind: input, shape index: {}]   ;;  %s4295_s12 = inlined_call_operand.vmem [shape: f32[1,128], index: 12, kind: input, shape index: {}]   ;;  %s4296_s13 = inlined_call_operand.hbm [shape: f32[2,1,128], index: 13, kind: output, shape index: {0}]   ;;  %s4297_s14 = inlined_call_operand.hbm [shape: f32[2,1,128], index: 14, kind: output, shape index: {1}]  }
   0x1   :  { %4308 = sst [smem:[#allocation25_spill]] %s4283_s0 }
   0x2   :  { %4309 = sst [smem:[#allocation26_spill]] %s4286_s3 }
   0x3   :  { %4310 = sst [smem:[#allocation27_spill]] %s4287_s4 }
   0x4   :  { %4311 = sst [smem:[#allocation28_spill]] %s4289_s6 }
   0x5   :  { %4312 = sst [smem:[#allocation29_spill]] %s4290_s7 }
   0x6   :  { %4313 = sst [smem:[#allocation30_spill]] %s4291_s8 }
   0x7   :  { %4314 = sst [smem:[#allocation31_spill]] %s4292_s9 }
   0x8   :  { %4315 = sst [smem:[#allocation32_spill]] %s4293_s10 }
   0x9   :  { %4316 = sst [smem:[#allocation33_spill]] %s4294_s11 }
   0xa   :  { %4317 = sst [smem:[#allocation34_spill]] %s4295_s12 }
   0xb   :  { %4318 = sst [smem:[#allocation35_spill]] %s4296_s13 }
   0xc   :  { %4319 = sst [smem:[#allocation36_spill]] %s4297_s14 }
   0xd   :  { %20 = vsyncpa [#allocation3], 0 }
   0xe   :  { %22 = vsyncpa [#allocation3 + $0x1], 0 }
   0xf   :  { %23 = vsyncpa [#allocation6], 0 }
  0x10   :  { %25 = vsyncpa [#allocation6 + $0x1], 0 }
  0x11   :  { %26 = vsyncpa [#allocation9], 0 }
  0x12   :  { %27 = vsyncpa [#allocation12], 0 }
  0x13   :  { %28 = vsyncpa [#allocation4], 0 }
  0x14   :  { %30 = vsyncpa [#allocation4 + $0x1], 0 }
  0x15   :  { %31 = vsyncpa [#allocation16], 0 }
  0x16   :  { %33 = vsyncpa [#allocation16 + $0x1], 0  ;;  %s3344_s29 = smov 0   ;;  %s3346_s30 = smov 0  }
  0x17   :  { %s3348_s15 = smov 0   ;;  %s3350_s16 = smov 0  }
  0x18 LB: > { %s3255_s17 = smov [#allocation7]   ;;  %s3365_s19 = sadd.s32 4294967295, %s3253_s16   ;;  %s3253_s16 = sphi %s3350_s16, %s4357_s16   ;;  %s3249_s15 = sphi %s3348_s15, %s4356_s15   ;;  %s3245_s30 = sphi %s3346_s30, %s4355_s30   ;;  %s3241_s29 = sphi %s3344_s29, %s4354_s29  }
  0x19   : > { %s396_s18 = sshll.u32 %s3255_s17, 4  ;;  %p2463_p0 = scmp.ge.s32.totalorder %s3253_s16, 1  ;;  %s3370_s18 = int_to_ptr.vmem [resolvable:$true] %s396_s18 }
  0x1a   : > { %p4301_p1 = scmp.eq.s32.totalorder %s3365_s19, 0  ;;  %p384_p2 = scmp.lt.s32.totalorder %s3253_s16, 3 }
  0x1b   : > { %s3256_s21 = smov [#allocation8]   ;;  %s3257_s24 = smov [#allocation11]  }
  0x1c   : > { %p3372_p3 = pnand %p2463_p0, %p384_p2  ;;  %s409_s22 = sshll.u32 %s3256_s21, 4  ;;  %s3385_s22 = int_to_ptr.vmem [resolvable:$true] %s409_s22 }
  0x1d   : > { %s441_s25 = sshll.u32 %s3257_s24, 4  ;;  %s4322_s3 = sld [smem:[#allocation26_spill]]  ;;  %s3387_s25 = int_to_ptr.vmem [resolvable:$true] %s441_s25 }
  0x1e   : > { %s4320_s20 = scalar_select %p3372_p3, 1, 0 }
  0x1f   : > { %p2689_p5 = pneg %p3372_p3 }
  0x21   : > { %p3381_p6 = pnand %p2689_p5, %p4301_p1 }
  0x23   : > { %s2939_s28 = scalar_lea.hbm %s4322_s3, 2048  ;;  %p3397_p8 = pneg %p3381_p6 }
  0x24   : > { %p2940_p7 = scmp.ne.s32.totalorder %s4322_s3, %s2939_s28  ;;  %p2946_p11 = scmp.lt.u32.totalorder %s2939_s28, %s4322_s3 }
  0x26   : > { %p2942_p9 = pnand %p3397_p8, %p2940_p7 }
  0x28   : > { %p2943_p10 = pneg %p2942_p9 }
  0x2a   : > { %p2948_p12 = pnand %p2946_p11, %p2943_p10 }
  0x2c   : > { %2951 = shalt.err (!%p2948_p12)
}
  0x2d   : > { %s2952_s14 = scalar_lea.vmem %s3370_s18, 2048  ;;  %p2960_p5 = scmp.lt.s32.totalorder %s3370_s18, %s3370_s18 }
  0x2e   : > { %p2953_p13 = scmp.ne.s32.totalorder %s3370_s18, %s2952_s14  ;;  %p2961_p4 = scmp.lt.s32.totalorder %s2952_s14, %s2952_s14 }
  0x30   : > { %p2955_p0 = pnand %p2953_p13, %p3397_p8  ;;  %p2962_p7 = por %p2961_p4, %p2960_p5 }
  0x32   : > { %p2956_p2 = pneg %p2955_p0 }
  0x34   : > { %p2963_p9 = pnand %p2962_p7, %p2956_p2 }
  0x36   : > { %2966 = shalt.err (!%p2963_p9)
}
  0x37   : > { %s4303_s26 = smov 128   ;;  %s4305_s13 = smov 8  }
  0x38   : > { %2692 = dma.hbm_to_vmem [thread:$0]  (!%p3381_p6), %s4322_s3, 2048, %s3370_s18, [#allocation6], %s4303_s26, %s4303_s26, %s4305_s13  }
  0x39   : > { %s4324_s4 = sld [smem:[#allocation27_spill]] }
  0x3f   : > { %s2967_s14 = scalar_lea.hbm %s4324_s4, 256 }
  0x40   : > { %p2968_p4 = scmp.ne.s32.totalorder %s4324_s4, %s2967_s14  ;;  %p2974_p12 = scmp.lt.u32.totalorder %s2967_s14, %s4324_s4 }
  0x42   : > { %p2970_p10 = pnand %p2968_p4, %p3397_p8 }
  0x44   : > { %p2971_p11 = pneg %p2970_p10 }
  0x46   : > { %p2976_p13 = pnand %p2974_p12, %p2971_p11 }
  0x48   : > { %2979 = shalt.err (!%p2976_p13)
}
  0x49   : > { %s2980_s18 = scalar_lea.vmem %s3385_s22, 256  ;;  %p2988_p7 = scmp.lt.s32.totalorder %s3385_s22, %s3385_s22 }
  0x4a   : > { %p2981_p0 = scmp.ne.s32.totalorder %s3385_s22, %s2980_s18  ;;  %p2989_p9 = scmp.lt.s32.totalorder %s2980_s18, %s2980_s18 }
  0x4c   : > { %p2983_p2 = pnand %p2981_p0, %p3397_p8  ;;  %p2990_p4 = por %p2989_p9, %p2988_p7 }
  0x4e   : > { %p2984_p5 = pneg %p2983_p2 }
  0x50   : > { %p2991_p10 = pnand %p2990_p4, %p2984_p5 }
  0x52   : > { %2994 = shalt.err (!%p2991_p10)
}
  0x53   : > { %2695 = dma.hbm_to_vmem [thread:$0]  (!%p3381_p6), %s4324_s4, 256, %s3385_s22, [#allocation9], %s4303_s26, %s4303_s26, %s4305_s13  }
  0x54   : > { %s4325_s8 = sld [smem:[#allocation30_spill]] }
  0x5a   : > { %s2995_s27 = scalar_lea.hbm %s4325_s8, 2048 }
  0x5b   : > { %p2996_p11 = scmp.ne.s32.totalorder %s4325_s8, %s2995_s27  ;;  %p3002_p0 = scmp.lt.u32.totalorder %s2995_s27, %s4325_s8 }
  0x5d   : > { %p2998_p12 = pnand %p2996_p11, %p3397_p8 }
  0x5f   : > { %p2999_p13 = pneg %p2998_p12 }
  0x61   : > { %p3004_p2 = pnand %p3002_p0, %p2999_p13 }
  0x63   : > { %3007 = shalt.err (!%p3004_p2)
}
  0x64   : > { %s3008_s22 = scalar_lea.vmem %s3387_s25, 2048  ;;  %p3016_p4 = scmp.lt.s32.totalorder %s3387_s25, %s3387_s25 }
  0x65   : > { %p3009_p5 = scmp.ne.s32.totalorder %s3387_s25, %s3008_s22  ;;  %p3017_p10 = scmp.lt.s32.totalorder %s3008_s22, %s3008_s22 }
  0x67   : > { %p3011_p7 = pnand %p3009_p5, %p3397_p8  ;;  %p3018_p11 = por %p3017_p10, %p3016_p4 }
  0x69   : > { %p3012_p9 = pneg %p3011_p7 }
  0x6b   : > { %p3019_p12 = pnand %p3018_p11, %p3012_p9 }
  0x6d   : > { %3022 = shalt.err (!%p3019_p12)
}
  0x6e   : > { %2701 = dma.hbm_to_vmem [thread:$0]  (!%p3381_p6), %s4325_s8, 2048, %s3387_s25, [#allocation12], %s4303_s26, %s4303_s26, %s4305_s13  }
  0x6f   : > { %s3260_s9 = smov [#allocation10]   ;;  %s3261_s12 = smov [#allocation13]  }
  0x70   : > { %s425_s10 = sshll.u32 %s3260_s9, 4  ;;  %s460_s27 = sshll.u32 %s3261_s12, 4  ;;  %s426_s10 = int_to_ptr.vmem [resolvable:$true] %s425_s10  ;;  %s461_s27 = int_to_ptr.vmem [resolvable:$true] %s460_s27 }
  0x71   : > { %s4326_s6 = sld [smem:[#allocation28_spill]] }
  0x77   : > { %s3023_s24 = scalar_lea.hbm %s4326_s6, 4096 }
  0x78   : > { %p3024_p13 = scmp.ne.s32.totalorder %s4326_s6, %s3023_s24  ;;  %p3030_p5 = scmp.lt.u32.totalorder %s3023_s24, %s4326_s6 }
  0x7a   : > { %p3026_p0 = pnand %p3024_p13, %p3397_p8 }
  0x7c   : > { %p3027_p2 = pneg %p3026_p0 }
  0x7e   : > { %p3032_p7 = pnand %p3030_p5, %p3027_p2 }
  0x80   : > { %3035 = shalt.err (!%p3032_p7)
}
  0x81   : > { %s3036_s25 = scalar_lea.vmem %s426_s10, 4096  ;;  %p3044_p11 = scmp.lt.s32.totalorder %s426_s10, %s426_s10 }
  0x82   : > { %p3037_p9 = scmp.ne.s32.totalorder %s426_s10, %s3036_s25  ;;  %p3045_p12 = scmp.lt.s32.totalorder %s3036_s25, %s3036_s25 }
  0x84   : > { %p3039_p4 = pnand %p3037_p9, %p3397_p8  ;;  %p3046_p1 = por %p3045_p12, %p3044_p11 }
  0x86   : > { %p3040_p10 = pneg %p3039_p4 }
  0x88   : > { %p3047_p3 = pnand %p3046_p1, %p3040_p10 }
  0x8a   : > { %3050 = shalt.err (!%p3047_p3)
}
  0x8b   : > { %2698 = dma.hbm_to_vmem [thread:$0]  (!%p3381_p6), %s4326_s6, 4096, %s426_s10, [#allocation9], %s4303_s26, %s4303_s26, %s4305_s13  }
  0x8c   : > { %s4327_s11 = sld [smem:[#allocation33_spill]] }
  0x92   : > { %s3051_s28 = scalar_lea.hbm %s4327_s11, 2048 }
  0x93   : > { %p3052_p1 = scmp.ne.s32.totalorder %s4327_s11, %s3051_s28  ;;  %p3058_p0 = scmp.lt.u32.totalorder %s3051_s28, %s4327_s11 }
  0x95   : > { %p3054_p3 = pnand %p3052_p1, %p3397_p8 }
  0x97   : > { %p3055_p13 = pneg %p3054_p3 }
  0x99   : > { %p3060_p2 = pnand %p3058_p0, %p3055_p13 }
  0x9b   : > { %3063 = shalt.err (!%p3060_p2)
}
  0x9c   : > { %s3064_s18 = scalar_lea.vmem %s461_s27, 2048  ;;  %p3072_p4 = scmp.lt.s32.totalorder %s461_s27, %s461_s27 }
  0x9d   : > { %p3065_p5 = scmp.ne.s32.totalorder %s461_s27, %s3064_s18  ;;  %p3073_p10 = scmp.lt.s32.totalorder %s3064_s18, %s3064_s18 }
  0x9f   : > { %p3067_p7 = pnand %p3065_p5, %p3397_p8  ;;  %p3074_p11 = por %p3073_p10, %p3072_p4 }
  0xa1   : > { %p3068_p9 = pneg %p3067_p7 }
  0xa3   : > { %p3075_p12 = pnand %p3074_p11, %p3068_p9 }
  0xa5   : > { %3078 = shalt.err (!%p3075_p12)
}
  0xa6   : > { %s3262_s10 = smov 64   ;;  %s3263_s21 = smov 4  }
  0xa7   : > { %2704 = dma.hbm_to_vmem [thread:$0]  (!%p3381_p6), %s4327_s11, 2048, %s461_s27, [#allocation12], %s3262_s10, %s3262_s10, %s3263_s21  }
  0xa8   : > { %s2462_s7 = sadd.s32 4294967294, %s3253_s16   ;;  %s3514_s9 = sadd.s32 1, %s3253_s16  }
  0xa9   : > { %s46_s12 = sadd.s32 1, %s3249_s15  ;;  %s43_s28 = ssub.s32 %s3253_s16, %s3514_s9 }
  0xaa   : > { %p53_p8 = scmp.ne.s32.totalorder %s3249_s15, %s3245_s30  ;;  %p44_p1 = scmp.eq.s32.totalorder %s43_s28, 0 }
  0xab   : > { %p54_p3 = scmp.eq.s32.totalorder %s3253_s16, 0  ;;  %p59_p13 = scmp.ne.s32.totalorder %s3245_s30, %s3241_s29 }
  0xac   : > { %p345_p0 = scmp.eq.s32.totalorder %s3365_s19, 1  ;;  %p4329_p5 = scmp.eq.s32.totalorder %s3365_s19, 0 }
  0xad   : > { %s3526_s17 = scalar_select %p44_p1, %s3249_s15, %s46_s12  }
  0xae   : > { %p55_p2 = por %p54_p3, %p53_p8  ;;  %p3530_p7 = por %p4329_p5, %p59_p13 }
  0xaf   : > { %4328 = sst [smem:[#allocation24_spill]] %s3526_s17  ;;  %p3534_p6 = por %p345_p0, %p53_p8 }
  0xb0   : > { %p351_p9 = scmp.eq.s32.totalorder %s2462_s7, 1  ;;  %p2724_p4 = scmp.lt.s32.totalorder %s3253_s16, 2 }
  0xb1   : > { %s4331_s27 = scalar_select %p3534_p6, 1, 0 }
  0xb2   : > { %s477_s24 = sand.u32 1, %s3249_s15   ;;  %p3540_p10 = por %p351_p9, %p59_p13 }
  0xb3   : > { %s3544_s22 = sshll.u32 %s477_s24, 7  ;;  %s2575_s18 = sshll.u32 %s3253_s16, 11 }
  0xb4   : > { %s4332_s14 = scalar_select %p3540_p10, 1, 0 }
  0xb5   : > { %s4333_s0 = sld [smem:[#allocation25_spill]]  ;;  %s481_s3 = scalar_lea.vmem [#allocation2], %s3544_s22 }
  0xb6   : > { %s488_s7 = sshll.u32 %s481_s3, 4  ;;  %p3553_p11 = pnand %p2724_p4, %p55_p2  ;;  %s3557_s7 = int_to_ptr.vmem [resolvable:$true] %s488_s7 }
  0xb7   : > { %s3562_s10 = scalar_lea.hbm %s4285_s2, %s2575_s18  ;;  %s3564_s21 = scalar_lea.sflag [#allocation3], %s477_s24 }
  0xb8   : > { %p3081_p8 = pneg %p3553_p11 }
  0xbb   : > { %s3550_s25 = scalar_lea.hbm %s4333_s0, %s2575_s18  ;;  %s3084_s6 = scalar_lea.hbm %s4333_s0, 4096 }
  0xbc   : > { %s3079_s13 = scalar_lea.hbm %s3550_s25, 2048  ;;  %p3085_p13 = scmp.lt.u32.totalorder %s3550_s25, %s4333_s0 }
  0xbd   : > { %p3080_p12 = scmp.ne.s32.totalorder %s3550_s25, %s3079_s13  ;;  %p3086_p0 = scmp.lt.u32.totalorder %s3084_s6, %s3079_s13 }
  0xbe   : > { %p3088_p5 = scmp.lt.u32.totalorder %s3079_s13, %s3550_s25 }
  0xbf   : > { %p3082_p1 = pnand %p3081_p8, %p3080_p12  ;;  %p3087_p2 = por %p3086_p0, %p3085_p13 }
  0xc1   : > { %p3083_p3 = pneg %p3082_p1  ;;  %p3089_p9 = por %p3088_p5, %p3087_p2 }
  0xc3   : > { %p3090_p4 = pnand %p3089_p9, %p3083_p3 }
  0xc5   : > { %3093 = shalt.err (!%p3090_p4)
}
  0xc6   : > { %s3094_s26 = scalar_lea.vmem %s3557_s7, 2048  ;;  %s3264_s4 = smov [#allocation2]  }
  0xc7   : > { %p3095_p12 = scmp.ne.s32.totalorder %s3557_s7, %s3094_s26  ;;  %s3099_s24 = sshll.u32 %s3264_s4, 4  ;;  %s3100_s24 = int_to_ptr.vmem [resolvable:$false] %s3099_s24 }
  0xc8   : > { %s3101_s8 = scalar_lea.vmem %s3100_s24, 4096  ;;  %p3102_p6 = scmp.lt.s32.totalorder %s3557_s7, %s3100_s24 }
  0xc9   : > { %p3097_p1 = pnand %p3095_p12, %p3081_p8  ;;  %p3103_p13 = scmp.lt.s32.totalorder %s3101_s8, %s3094_s26 }
  0xcb   : > { %p3098_p10 = pneg %p3097_p1  ;;  %p3104_p0 = por %p3103_p13, %p3102_p6 }
  0xcd   : > { %p3105_p2 = pnand %p3104_p0, %p3098_p10 }
  0xcf   : > { %3108 = shalt.err (!%p3105_p2)
}
  0xd0   : > { %s4335_s6 = smov 8   ;;  %s4336_s11 = smov 128  }
  0xd1   : > { %2708 = dma.hbm_to_vmem [thread:$0]  (!%p3553_p11), %s3550_s25, 2048, %s3557_s7, %s3564_s21, %s4336_s11, %s4336_s11, %s4335_s6  }
  0xd2   : > { %s508_s13 = scalar_lea.vmem [#allocation5], %s3544_s22  ;;  %s504_s28 = sand.u32 1, %s3253_s16  }
  0xd3   : > { %s515_s18 = sshll.u32 %s508_s13, 4  ;;  %s3599_s3 = scalar_lea.sflag [#allocation6], %s504_s28  ;;  %s3597_s18 = int_to_ptr.vmem [resolvable:$true] %s515_s18 }
  0xd4   : > { %s3109_s26 = scalar_lea.hbm %s3562_s10, 2048  ;;  %s3114_s8 = scalar_lea.hbm %s4285_s2, 4096 }
  0xd5   : > { %p3110_p6 = scmp.ne.s32.totalorder %s3562_s10, %s3109_s26  ;;  %p3115_p5 = scmp.lt.u32.totalorder %s3562_s10, %s4285_s2 }
  0xd6   : > { %p3116_p9 = scmp.lt.u32.totalorder %s3114_s8, %s3109_s26  ;;  %p3118_p12 = scmp.lt.u32.totalorder %s3109_s26, %s3562_s10 }
  0xd7   : > { %p3112_p10 = pnand %p3110_p6, %p3081_p8 }
  0xd8   : > { %p3117_p4 = por %p3116_p9, %p3115_p5 }
  0xd9   : > { %p3113_p3 = pneg %p3112_p10 }
  0xda   : > { %p3119_p1 = por %p3118_p12, %p3117_p4 }
  0xdc   : > { %p3120_p13 = pnand %p3119_p1, %p3113_p3 }
  0xde   : > { %3123 = shalt.err (!%p3120_p13)
}
  0xdf   : > { %s3124_s22 = scalar_lea.vmem %s3597_s18, 2048  ;;  %s3265_s25 = smov [#allocation5]  }
  0xe0   : > { %p3125_p0 = scmp.ne.s32.totalorder %s3597_s18, %s3124_s22  ;;  %s3129_s7 = sshll.u32 %s3265_s25, 4  ;;  %s3130_s7 = int_to_ptr.vmem [resolvable:$false] %s3129_s7 }
  0xe1   : > { %s3131_s0 = scalar_lea.vmem %s3130_s7, 4096  ;;  %p3132_p10 = scmp.lt.s32.totalorder %s3597_s18, %s3130_s7 }
  0xe2   : > { %p3127_p2 = pnand %p3125_p0, %p3081_p8  ;;  %p3133_p5 = scmp.lt.s32.totalorder %s3131_s0, %s3124_s22 }
  0xe4   : > { %p3128_p6 = pneg %p3127_p2  ;;  %p3134_p9 = por %p3133_p5, %p3132_p10 }
  0xe6   : > { %p3135_p4 = pnand %p3134_p9, %p3128_p6 }
  0xe8   : > { %3138 = shalt.err (!%p3135_p4)
}
  0xe9   : > { %2711 = dma.hbm_to_vmem [thread:$0]  (!%p3553_p11), %s3562_s10, 2048, %s3597_s18, %s3599_s3, %s4336_s11, %s4336_s11, %s4335_s6  }
  0xea   : > { %p4337_p8 = scmp.ne.s32.totalorder %s4320_s20, 0 }
  0xeb   : > { %s3631_s17 = sand.u32 (!%p4337_p8), 1, %s3245_s30  }
  0xec   : > { %527 = sbr.rel (%p4337_p8) target bundleno = 1565 (0x61d), region = 72  ;;  %s2477_s21 = sshll.u32 (!%p4337_p8), %s3631_s17, 7 }
  0xed   : > { %s530_s13 = scalar_lea.sflag (!%p4337_p8), [#allocation3], %s3631_s17  ;;  %s3635_s28 = scalar_lea.vmem (!%p4337_p8), [#allocation2], %s2477_s21 }
  0xf3   : > { %3212 = dma.done.wait (%p3530_p7), %s530_s13, 2048  }
  0xf4   : > { %3214 = vsyncadd (%p3530_p7), %s530_s13, 4294965248  ;;  %s538_s12 = sand.u32 1, %s3365_s19   ;;  %s3642_s10 = scalar_lea.vmem [#allocation5], %s2477_s21 }
  0xf5   : > { %s539_s20 = scalar_lea.sflag [#allocation6], %s538_s12 }
  0xf6   : > { %3216 = dma.done.wait (%p3530_p7), %s539_s20, 2048  }
  0xf7   : > { %3218 = vsyncadd (%p3530_p7), %s539_s20, 4294965248  ;;  %p4338_p11 = scmp.eq.s32.totalorder %s3365_s19, 0 }
  0xf9   : > { %3220 = dma.done.wait (%p4338_p11), [#allocation6], 2048   ;;  %p4339_p3 = pmov %p4338_p11 }
  0xfb   : > { %3222 = vsyncadd (%p4339_p3), [#allocation6], 4294965248  ;;  %p4340_p12 = pmov %p4339_p3 }
  0xfc   : > { %p4341_p1 = pmov %p4339_p3 }
  0xfd   : > { %3224 = dma.done.wait (%p4340_p12), [#allocation9], 4352  }
  0xfe   : > { %3226 = vsyncadd (%p4341_p1), [#allocation9], 4294962944  ;;  %p4342_p13 = pmov %p4341_p1 }
  0xff   : > { %p4343_p0 = pmov %p4341_p1 }
 0x100   : > { %3228 = dma.done.wait (%p4342_p13), [#allocation12], 4096  }
 0x101   : > { %3230 = vsyncadd (%p4343_p0), [#allocation12], 4294963200  ;;  %v3266_v0 = vmov 0   ;;  %v2773_v1 = vld [vmem:[#allocation7 + $0x4] ss:$8 sps:$4 sm:$0xff]   ;;  %p619_p7 = scmp.lt.s32.totalorder %s3365_s19, 1 }
 0x102   : > { %923 = vmatprep.mubr.bf16.mxu1 %v3266_v0  ;;  %794 = vmatprep.mubr.bf16.mxu0 %v3266_v0  ;;  %v2775_v2 = vld [vmem:[#allocation7] ss:$8 sps:$4 sm:$0xff]   ;;  %v2776_v3 = vld [vmem:[#allocation7 + $0x14] ss:$8 sps:$4 sm:$0xff]   ;;  %v2778_v4 = vld [vmem:[#allocation7 + $0x10] ss:$8 sps:$4 sm:$0xff]  }
 0x103   : > { %762 = vmatprep.subr.bf16.mxu0 %v2773_v1  ;;  %v2779_v5 = vld [vmem:[#allocation7 + $0x24] ss:$8 sps:$4 sm:$0xff]   ;;  %s620_s23 = scalar_select %p619_p7, %s3365_s19, 1  ;;  %v2781_v6 = vld [vmem:[#allocation7 + $0x20] ss:$8 sps:$4 sm:$0xff]   ;;  %vm887_vm0 = vcmask 130048  }
 0x104   : > { %763 = vmatpush1.bf16.msra.mxu0 %v2775_v2  ;;  %v2782_v7 = vld [vmem:[#allocation7 + $0x34] ss:$8 sps:$4 sm:$0xff]   ;;  %v2794_v8 = vld [vmem:[#allocation8 + $0x4] ss:$8 sps:$4 sm:$0xff]   ;;  %v2796_v9 = vld [vmem:[#allocation8] ss:$8 sps:$4 sm:$0xff]  }
 0x105   : > { %764 = vmatprep.subr.bf16.mxu0 %v2776_v3  ;;  %s621_s18 = scalar_lea.vmem %s4284_s1, %s620_s23  ;;  %v2784_v10 = vld [vmem:[#allocation7 + $0x30] ss:$8 sps:$4 sm:$0xff]   ;;  %v2785_v11 = vld [vmem:[#allocation7 + $0x44] ss:$8 sps:$4 sm:$0xff]   ;;  %891 = vmatprep.subr.bf16.mxu1 %v2794_v8  ;;  %v2787_v14 = vld [vmem:[#allocation7 + $0x40] ss:$8 sps:$4 sm:$0xff]  }
 0x106   : > { %v640_v12 = vld [vmem:[%s621_s18] sm:$0x1]  ;;  %892 = vmatpush1.bf16.msra.mxu1 %v2796_v9  ;;  %v2788_v15 = vld [vmem:[#allocation7 + $0x54] ss:$8 sps:$4 sm:$0xff]   ;;  %v2790_v16 = vld [vmem:[#allocation7 + $0x50] ss:$8 sps:$4 sm:$0xff]  }
 0x107   : > { %v3667_v13 = vpack.c.bf16 %v640_v12, %v640_v12  ;;  %v2800_v17 = vld [vmem:[#allocation10] ss:$8 sps:$4 sm:$0xff]   ;;  %v2802_v18 = vld [vmem:[#allocation10 + $0x4] ss:$8 sps:$4 sm:$0xff]   ;;  %v2791_v19 = vld [vmem:[#allocation7 + $0x64] ss:$8 sps:$4 sm:$0xff]  }
 0x108   : > { %765 = vmatpush1.bf16.msra.mxu0 %v2778_v4  ;;  %1268 = vmatprep.subr.bf16.mxu1 %v2802_v18  ;;  %v2805_v20 = vld [vmem:[#allocation10 + $0x14] ss:$8 sps:$4 sm:$0xff]   ;;  %v2803_v21 = vld [vmem:[#allocation10 + $0x10] ss:$8 sps:$4 sm:$0xff]   ;;  %v2808_v22 = vld [vmem:[#allocation10 + $0x24] ss:$8 sps:$4 sm:$0xff]  }
 0x109   : > { %766 = vmatprep.subr.bf16.mxu0 %v2779_v5  ;;  %2502 = vmatmul.mubr.msk.bf16.vlgmr.msra.gmra.mrb[0].mxu1 %vm887_vm0, %v3667_v13  ;;  %v2793_v23 = vld [vmem:[#allocation7 + $0x60] ss:$8 sps:$4 sm:$0xff]   ;;  %v2797_v24 = vld [vmem:[#allocation7 + $0x74] ss:$8 sps:$4 sm:$0xff]   ;;  %v2799_v25 = vld [vmem:[#allocation7 + $0x70] ss:$8 sps:$4 sm:$0xff]  }
 0x10a   : > { %1269 = vmatpush1.bf16.msra.mxu1 %v2800_v17  ;;  %v2806_v26 = vld [vmem:[#allocation10 + $0x20] ss:$8 sps:$4 sm:$0xff]   ;;  %v624_v27 = vld [vmem:[%s3635_s28] sm:$0xff]  ;;  %v625_v29 = vld [vmem:[%s3635_s28 + $0x8] sm:$0xff]  ;;  %s4344_s8 = sld [smem:[#allocation31_spill]]  ;;  %s4345_s7 = sld [smem:[#allocation29_spill]] }
 0x10b   : > { %1270 = vmatprep.subr.bf16.mxu1 %v2805_v20  ;;  %v2811_v28 = vld [vmem:[#allocation10 + $0x34] ss:$8 sps:$4 sm:$0xff]   ;;  %v2809_v30 = vld [vmem:[#allocation10 + $0x30] ss:$8 sps:$4 sm:$0xff]   ;;  %v657_v31 = vpack.c.bf16 %v625_v29, %v624_v27  ;;  %v2814_v32 = vld [vmem:[#allocation10 + $0x44] ss:$8 sps:$4 sm:$0xff]  }
 0x10c   : > { %767 = vmatpush1.bf16.msra.mxu0 %v2781_v6  ;;  %v626_v33 = vld [vmem:[%s3635_s28 + $0x10] sm:$0xff]  ;;  %v627_v34 = vld [vmem:[%s3635_s28 + $0x18] sm:$0xff]  ;;  %v2817_v36 = vld [vmem:[#allocation10 + $0x54] ss:$8 sps:$4 sm:$0xff]   ;;  %s4346_s20 = sld [smem:[#allocation32_spill]]  ;;  %s4347_s6 = sld [smem:[#allocation34_spill]] }
 0x10d   : > { %768 = vmatprep.subr.bf16.mxu0 %v2782_v7  ;;  %v2812_v35 = vld [vmem:[#allocation10 + $0x40] ss:$8 sps:$4 sm:$0xff]   ;;  %v2815_v37 = vld [vmem:[#allocation10 + $0x50] ss:$8 sps:$4 sm:$0xff]   ;;  %v2820_v38 = vld [vmem:[#allocation10 + $0x64] ss:$8 sps:$4 sm:$0xff]   ;;  %v658_v39 = vpack.c.bf16 %v627_v34, %v626_v33 }
 0x10e   : > { %1271 = vmatpush1.bf16.msra.mxu1 %v2803_v21  ;;  %v2818_v40 = vld [vmem:[#allocation10 + $0x60] ss:$8 sps:$4 sm:$0xff]   ;;  %v2823_v41 = vld [vmem:[#allocation10 + $0x74] ss:$8 sps:$4 sm:$0xff]   ;;  %v2821_v44 = vld [vmem:[#allocation10 + $0x70] ss:$8 sps:$4 sm:$0xff]  }
 0x10f   : > { %1272 = vmatprep.subr.bf16.mxu1 %v2808_v22  ;;  %v628_v42 = vld [vmem:[%s3635_s28 + $0x20] sm:$0xff]  ;;  %v629_v43 = vld [vmem:[%s3635_s28 + $0x28] sm:$0xff]  ;;  %v2826_v45 = vld [vmem:[#allocation10 + $0x84] ss:$8 sps:$4 sm:$0xff]   ;;  %v932_v22 = vlaneseq  ;;  %s611_s11 = scalar_lea.vmem [#allocation14], %s3631_s17  ;;  %s617_s3 = scalar_lea.vmem [#allocation15], %s3631_s17 }
 0x110   : > { %769 = vmatpush1.bf16.msra.mxu0 %v2784_v10  ;;  %v659_v46 = vpack.c.bf16 %v629_v43, %v628_v42  ;;  %v2824_v47 = vld [vmem:[#allocation10 + $0x80] ss:$8 sps:$4 sm:$0xff]   ;;  %v2829_v48 = vld [vmem:[#allocation10 + $0x94] ss:$8 sps:$4 sm:$0xff]   ;;  %v2827_v51 = vld [vmem:[#allocation10 + $0x90] ss:$8 sps:$4 sm:$0xff]  }
 0x111   : > { %770 = vmatprep.subr.bf16.mxu0 %v2785_v11  ;;  %v630_v49 = vld [vmem:[%s3635_s28 + $0x30] sm:$0xff]  ;;  %v631_v50 = vld [vmem:[%s3635_s28 + $0x38] sm:$0xff]  ;;  %v2835_v55 = vld [vmem:[#allocation10 + $0xb4] ss:$8 sps:$4 sm:$0xff]   ;;  %s2276_s18 = sshll.u32 %s611_s11, 4  ;;  %s2289_s26 = sshll.u32 %s617_s3, 4  ;;  %s4208_s18 = int_to_ptr.vmem [resolvable:$true] %s2276_s18  ;;  %s4210_s26 = int_to_ptr.vmem [resolvable:$true] %s2289_s26 }
 0x112   : > { %1273 = vmatpush1.bf16.msra.mxu1 %v2806_v26  ;;  %v660_v52 = vpack.c.bf16 %v631_v50, %v630_v49  ;;  %v2832_v53 = vld [vmem:[#allocation10 + $0xa4] ss:$8 sps:$4 sm:$0xff]   ;;  %v2830_v54 = vld [vmem:[#allocation10 + $0xa0] ss:$8 sps:$4 sm:$0xff]   ;;  %v632_v56 = vld [vmem:[%s3635_s28 + $0x40] sm:$0xff]  ;;  %s4348_s22 = sld [smem:[#allocation35_spill]] }
 0x113   : > { %1274 = vmatprep.subr.bf16.mxu1 %v2811_v28  ;;  %v633_v57 = vld [vmem:[%s3635_s28 + $0x48] sm:$0xff]  ;;  %v634_v60 = vld [vmem:[%s3635_s28 + $0x50] sm:$0xff]  ;;  %v635_v61 = vld [vmem:[%s3635_s28 + $0x58] sm:$0xff]  ;;  %s2260_s0 = scalar_lea.sflag [#allocation4], %s3631_s17  ;;  %s3139_s21 = scalar_lea.vmem %s4208_s18, 16 }
 0x114   : > { %771 = vmatpush1.bf16.msra.mxu0 %v2787_v14  ;;  %v2833_v58 = vld [vmem:[#allocation10 + $0xb0] ss:$8 sps:$4 sm:$0xff]   ;;  %v661_v59 = vpack.c.bf16 %v633_v57, %v632_v56  ;;  %v662_v62 = vpack.c.bf16 %v635_v61, %v634_v60  ;;  %v638_v3 = vld [vmem:[%s3635_s28 + $0x70] sm:$0xff]  ;;  %v639_v4 = vld [vmem:[%s3635_s28 + $0x78] sm:$0xff]  ;;  %p3140_p2 = scmp.ne.s32.totalorder %s4208_s18, %s3139_s21  ;;  %p4349_p6 = scmp.ne.s32.totalorder %s4331_s27, 0 }
 0x115   : > { %772 = vmatprep.subr.bf16.mxu0 %v2788_v15  ;;  %v636_v63 = vld [vmem:[%s3635_s28 + $0x60] sm:$0xff]  ;;  %v637_v1 = vld [vmem:[%s3635_s28 + $0x68] sm:$0xff]  ;;  %v664_v5 = vpack.c.bf16 %v639_v4, %v638_v3  ;;  %v2836_v6 = vld [vmem:[#allocation10 + $0xc0] ss:$8 sps:$4 sm:$0xff]   ;;  %s3267_s13 = smov [#allocation14]  }
 0x116   : > { %1275 = vmatpush1.bf16.msra.mxu1 %v2809_v30  ;;  %v663_v2 = vpack.c.bf16 %v637_v1, %v636_v63  ;;  %v2838_v7 = vld [vmem:[#allocation10 + $0xc4] ss:$8 sps:$4 sm:$0xff]   ;;  %v2841_v8 = vld [vmem:[#allocation10 + $0xd4] ss:$8 sps:$4 sm:$0xff]   ;;  %v2839_v9 = vld [vmem:[#allocation10 + $0xd0] ss:$8 sps:$4 sm:$0xff]   ;;  %p3141_p10 = pnand %p3140_p2, %p4349_p6 }
 0x117   : > { %1276 = vmatprep.subr.bf16.mxu1 %v2814_v32  ;;  %v2844_v10 = vld [vmem:[#allocation10 + $0xe4] ss:$8 sps:$4 sm:$0xff]   ;;  %v2842_v11 = vld [vmem:[#allocation10 + $0xe0] ss:$8 sps:$4 sm:$0xff]   ;;  %v2847_v12 = vld [vmem:[#allocation10 + $0xf4] ss:$8 sps:$4 sm:$0xff]  }
 0x118   : > { %773 = vmatpush1.bf16.msra.mxu0 %v2790_v16  ;;  %v2845_v14 = vld [vmem:[#allocation10 + $0xf0] ss:$8 sps:$4 sm:$0xff]   ;;  %v2848_v15 = vld [vmem:[#allocation11] ss:$8 sps:$4 sm:$0xff]   ;;  %v2850_v16 = vld [vmem:[#allocation11 + $0x4] ss:$8 sps:$4 sm:$0xff]   ;;  %p3142_p5 = pneg %p3141_p10 }
 0x119   : > { %774 = vmatprep.subr.bf16.mxu0 %v2791_v19  ;;  %v2853_v17 = vld [vmem:[#allocation11 + $0x14] ss:$8 sps:$4 sm:$0xff]   ;;  %v2851_v18 = vld [vmem:[#allocation11 + $0x10] ss:$8 sps:$4 sm:$0xff]   ;;  %s3143_s12 = sshll.u32 %s3267_s13, 4  ;;  %s3144_s12 = int_to_ptr.vmem [resolvable:$false] %s3143_s12 }
 0x11a   : > { %1277 = vmatpush1.bf16.msra.mxu1 %v2812_v35  ;;  %v972_v26 = vld [vmem:[%s4288_s5] sm:$0x3]  ;;  %p3146_p9 = scmp.lt.s32.totalorder %s4208_s18, %s3144_s12 }
 0x11b   : > { %1278 = vmatprep.subr.bf16.mxu1 %v2817_v36 }
 0x11c   : > { %775 = vmatpush1.bf16.msra.mxu0 %v2793_v23 }
 0x11d   : > { %776 = vmatprep.subr.bf16.mxu0 %v2797_v24  ;;  %v933_v24 = vshrl.u32 %v932_v22, 7 }
 0x11e   : > { %1279 = vmatpush1.bf16.msra.mxu1 %v2815_v37 }
 0x11f   : > { %1280 = vmatprep.subr.bf16.mxu1 %v2820_v38  ;;  %v3700_v27 = vsub.s32 1, %v933_v24 }
 0x120   : > { %777 = vmatpush1.bf16.msra.mxu0 %v2799_v25  ;;  %v3695_v25 = vsub.s32 0, %v933_v24 }
 0x121   : > { %1565 = vmatprep.subr.bf16.mxu0 %v2850_v16  ;;  %v3712_v32 = vrot.slane %v972_v26, %v3700_v27 }
 0x122   : > { %1281 = vmatpush1.bf16.msra.mxu1 %v2818_v40  ;;  %v3709_v30 = vrot.slane %v972_v26, %v3695_v25 }
 0x123   : > { %795 = vmatmul.mubr.bf16.vlgmr.msra.gmra.mrb[0].mxu0 %v657_v31  ;;  %1282 = vmatprep.subr.bf16.mxu1 %v2823_v41 }
 0x124   : > { %804 = vmatprep.mubr.bf16.mxu0 %v3266_v0  ;;  %1566 = vmatpush1.bf16.msra.mxu0 %v2848_v15 }
 0x125   : > { %1567 = vmatprep.subr.bf16.mxu0 %v2853_v17 }
 0x126   : > { %1283 = vmatpush1.bf16.msra.mxu1 %v2821_v44 }
 0x127   : > { %1284 = vmatprep.subr.bf16.mxu1 %v2826_v45 }
 0x128   : > { %1568 = vmatpush1.bf16.msra.mxu0 %v2851_v18 }
 0x12a   : > { %1285 = vmatpush1.bf16.msra.mxu1 %v2824_v47 }
 0x12b   : > { %805 = vmatmul.mubr.bf16.gmra.mrb[4].mxu0 %v658_v39  ;;  %1286 = vmatprep.subr.bf16.mxu1 %v2829_v48 }
 0x12c   : > { %814 = vmatprep.mubr.bf16.mxu0 %v3266_v0 }
 0x12e   : > { %1287 = vmatpush1.bf16.msra.mxu1 %v2827_v51 }
 0x12f   : > { %1288 = vmatprep.subr.bf16.mxu1 %v2832_v53 }
 0x132   : > { %1289 = vmatpush1.bf16.msra.mxu1 %v2830_v54 }
 0x133   : > { %815 = vmatmul.mubr.bf16.gmra.mrb[8].mxu0 %v659_v46  ;;  %1290 = vmatprep.subr.bf16.mxu1 %v2835_v55 }
 0x134   : > { %824 = vmatprep.mubr.bf16.mxu0 %v3266_v0 }
 0x136   : > { %1291 = vmatpush1.bf16.msra.mxu1 %v2833_v58 }
 0x137   : > { %1292 = vmatprep.subr.bf16.mxu1 %v2838_v7 }
 0x13a   : > { %1293 = vmatpush1.bf16.msra.mxu1 %v2836_v6 }
 0x13b   : > { %825 = vmatmul.mubr.bf16.gmra.mrb[12].mxu0 %v660_v52  ;;  %1294 = vmatprep.subr.bf16.mxu1 %v2841_v8 }
 0x13c   : > { %834 = vmatprep.mubr.bf16.mxu0 %v3266_v0 }
 0x13e   : > { %1295 = vmatpush1.bf16.msra.mxu1 %v2839_v9 }
 0x13f   : > { %1296 = vmatprep.subr.bf16.mxu1 %v2844_v10 }
 0x142   : > { %1297 = vmatpush1.bf16.msra.mxu1 %v2842_v11 }
 0x143   : > { %835 = vmatmul.mubr.bf16.gmra.mrb[16].mxu0 %v661_v59  ;;  %1298 = vmatprep.subr.bf16.mxu1 %v2847_v12 }
 0x144   : > { %844 = vmatprep.mubr.bf16.mxu0 %v3266_v0 }
 0x146   : > { %1299 = vmatpush1.bf16.msra.mxu1 %v2845_v14 }
 0x147   : > { %2641 = vmatprep.subr.bf16.mxu1 %v2850_v16 }
 0x14b   : > { %845 = vmatmul.mubr.bf16.gmra.mrb[20].mxu0 %v662_v62 }
 0x14c   : > { %854 = vmatprep.mubr.bf16.mxu0 %v3266_v0 }
 0x153   : > { %855 = vmatmul.mubr.bf16.gmra.mrb[24].mxu0 %v663_v2 }
 0x154   : > { %864 = vmatprep.mubr.bf16.mxu0 %v3266_v0 }
 0x15b   : > { %865 = vmatmul.mubr.bf16.gmra.mrb[28].mxu0 %v664_v5 }
 0x15c   : > { %1597 = vmatprep.mubr.bf16.mxu0 %v3266_v0 }
 0x1dc   : > { %v925_v19 = vpop.f32.mrb[0].mxu1 }
 0x1dd   : > { %v927_v20 = vpop.f32.mrb[1].mxu1  ;;  %v3703_v28 = vrot.slane %v925_v19, %v3695_v25 }
 0x1de   : > { %v929_v21 = vpop.f32.mrb[2].mxu1  ;;  %v3706_v29 = vrot.slane %v927_v20, %v3695_v25 }
 0x1df   : > { %v930_v23 = vpop.f32.mrb[3].mxu1 }
 0x1f6   : > { %v796_v31 = vpop.f32.mrb[0].mxu0 }
 0x1f7   : > { %v940_v33 = vadd.f32 %v3703_v28, %v796_v31  ;;  %v798_v34 = vpop.f32.mrb[1].mxu0 }
 0x1f8   : > { %v941_v35 = vadd.f32 %v3706_v29, %v798_v34  ;;  %v800_v36 = vpop.f32.mrb[2].mxu0 }
 0x1f9   : > { %v984_v37 = vadd.f32 %v3709_v30, %v940_v33  ;;  %v942_v38 = vadd.f32 %v3703_v28, %v800_v36  ;;  %v802_v39 = vpop.f32.mrb[3].mxu0 }
 0x1fa   : > { %v985_v40 = vadd.f32 %v3712_v32, %v941_v35  ;;  %v943_v41 = vadd.f32 %v3706_v29, %v802_v39 }
 0x1fb   : > { %v986_v42 = vadd.f32 %v3709_v30, %v942_v38  ;;  %v1016_v44 = vmax.f32 %v984_v37, 0.0 }
 0x1fc   : > { %v987_v43 = vadd.f32 %v3712_v32, %v943_v41  ;;  %v1017_v46 = vmax.f32 %v985_v40, 0.0 }
 0x1fd   : > { %v1018_v45 = vmax.f32 %v986_v42, 0.0 }
 0x1fe   : > { %v1019_v47 = vmax.f32 %v987_v43, 0.0  ;;  %v806_v48 = vpop.f32.mrb[4].mxu0 }
 0x1ff   : > { %v1048_v49 = vpack.c.bf16 %v1018_v45, %v1016_v44  ;;  %v944_v50 = vadd.f32 %v3703_v28, %v806_v48  ;;  %v808_v51 = vpop.f32.mrb[5].mxu0 }
 0x200   : > { %v945_v52 = vadd.f32 %v3706_v29, %v808_v51  ;;  %v810_v53 = vpop.f32.mrb[6].mxu0  ;;  %v1049_v54 = vpack.c.bf16 %v1019_v47, %v1017_v46 }
 0x201   : > { %v988_v55 = vadd.f32 %v3709_v30, %v944_v50  ;;  %v946_v56 = vadd.f32 %v3703_v28, %v810_v53  ;;  %v812_v57 = vpop.f32.mrb[7].mxu0 }
 0x202   : > { %v989_v58 = vadd.f32 %v3712_v32, %v945_v52  ;;  %v947_v59 = vadd.f32 %v3706_v29, %v812_v57  ;;  %1300 = vmatprep.mubr.bf16.mxu1 %v1049_v54 }
 0x203   : > { %v990_v60 = vadd.f32 %v3709_v30, %v946_v56  ;;  %1301 = vmatmul.mubr.bf16.vlgmr.msra.gmra.mrb[4].mxu1 %v1048_v49  ;;  %v1020_v62 = vmax.f32 %v988_v55, 0.0 }
 0x204   : > { %v991_v61 = vadd.f32 %v3712_v32, %v947_v59  ;;  %2649 = vmatpush1.bf16.msra.mxu1 %v2848_v15  ;;  %v1021_v1 = vmax.f32 %v989_v58, 0.0 }
 0x205   : > { %v1022_v63 = vmax.f32 %v990_v60, 0.0  ;;  %2642 = vmatprep.subr.bf16.mxu1 %v2853_v17 }
 0x206   : > { %v1023_v2 = vmax.f32 %v991_v61, 0.0  ;;  %v816_v3 = vpop.f32.mrb[8].mxu0 }
 0x207   : > { %v948_v4 = vadd.f32 %v3703_v28, %v816_v3  ;;  %v818_v5 = vpop.f32.mrb[9].mxu0  ;;  %v1050_v6 = vpack.c.bf16 %v1022_v63, %v1020_v62 }
 0x208   : > { %v949_v7 = vadd.f32 %v3706_v29, %v818_v5  ;;  %v820_v8 = vpop.f32.mrb[10].mxu0  ;;  %v1051_v9 = vpack.c.bf16 %v1023_v2, %v1021_v1  ;;  %2650 = vmatpush1.bf16.msra.mxu1 %v2851_v18 }
 0x209   : > { %v992_v10 = vadd.f32 %v3709_v30, %v948_v4  ;;  %v950_v11 = vadd.f32 %v3703_v28, %v820_v8  ;;  %v822_v12 = vpop.f32.mrb[11].mxu0 }
 0x20a   : > { %v993_v14 = vadd.f32 %v3712_v32, %v949_v7  ;;  %v951_v15 = vadd.f32 %v3706_v29, %v822_v12  ;;  %1310 = vmatprep.mubr.bf16.mxu1 %v1051_v9 }
 0x20b   : > { %v994_v16 = vadd.f32 %v3709_v30, %v950_v11  ;;  %1311 = vmatmul.mubr.bf16.gmra.mrb[8].mxu1 %v1050_v6  ;;  %v1024_v19 = vmax.f32 %v992_v10, 0.0 }
 0x20c   : > { %v995_v17 = vadd.f32 %v3712_v32, %v951_v15  ;;  %v1025_v21 = vmax.f32 %v993_v14, 0.0 }
 0x20d   : > { %v1026_v20 = vmax.f32 %v994_v16, 0.0 }
 0x20e   : > { %v1027_v22 = vmax.f32 %v995_v17, 0.0  ;;  %v826_v18 = vpop.f32.mrb[12].mxu0 }
 0x20f   : > { %v952_v23 = vadd.f32 %v3703_v28, %v826_v18  ;;  %v828_v24 = vpop.f32.mrb[13].mxu0  ;;  %v1052_v26 = vpack.c.bf16 %v1026_v20, %v1024_v19 }
 0x210   : > { %v953_v31 = vadd.f32 %v3706_v29, %v828_v24  ;;  %v830_v33 = vpop.f32.mrb[14].mxu0  ;;  %v1053_v34 = vpack.c.bf16 %v1027_v22, %v1025_v21 }
 0x211   : > { %v996_v35 = vadd.f32 %v3709_v30, %v952_v23  ;;  %v954_v36 = vadd.f32 %v3703_v28, %v830_v33  ;;  %v832_v37 = vpop.f32.mrb[15].mxu0 }
 0x212   : > { %v997_v38 = vadd.f32 %v3712_v32, %v953_v31  ;;  %v955_v39 = vadd.f32 %v3706_v29, %v832_v37  ;;  %1320 = vmatprep.mubr.bf16.mxu1 %v1053_v34 }
 0x213   : > { %v998_v40 = vadd.f32 %v3709_v30, %v954_v36  ;;  %1321 = vmatmul.mubr.bf16.gmra.mrb[12].mxu1 %v1052_v26  ;;  %v1028_v42 = vmax.f32 %v996_v35, 0.0 }
 0x214   : > { %v999_v41 = vadd.f32 %v3712_v32, %v955_v39  ;;  %v1029_v44 = vmax.f32 %v997_v38, 0.0 }
 0x215   : > { %v1030_v43 = vmax.f32 %v998_v40, 0.0 }
 0x216   : > { %v1031_v45 = vmax.f32 %v999_v41, 0.0  ;;  %v836_v46 = vpop.f32.mrb[16].mxu0 }
 0x217   : > { %v956_v47 = vadd.f32 %v3703_v28, %v836_v46  ;;  %v838_v48 = vpop.f32.mrb[17].mxu0  ;;  %v1054_v49 = vpack.c.bf16 %v1030_v43, %v1028_v42 }
 0x218   : > { %v957_v50 = vadd.f32 %v3706_v29, %v838_v48  ;;  %v840_v51 = vpop.f32.mrb[18].mxu0  ;;  %v1055_v52 = vpack.c.bf16 %v1031_v45, %v1029_v44 }
 0x219   : > { %v1000_v53 = vadd.f32 %v3709_v30, %v956_v47  ;;  %v958_v54 = vadd.f32 %v3703_v28, %v840_v51  ;;  %v842_v55 = vpop.f32.mrb[19].mxu0 }
 0x21a   : > { %v1001_v56 = vadd.f32 %v3712_v32, %v957_v50  ;;  %v959_v57 = vadd.f32 %v3706_v29, %v842_v55  ;;  %1330 = vmatprep.mubr.bf16.mxu1 %v1055_v52 }
 0x21b   : > { %v1002_v58 = vadd.f32 %v3709_v30, %v958_v54  ;;  %1331 = vmatmul.mubr.bf16.gmra.mrb[16].mxu1 %v1054_v49  ;;  %v1032_v60 = vmax.f32 %v1000_v53, 0.0 }
 0x21c   : > { %v1003_v59 = vadd.f32 %v3712_v32, %v959_v57  ;;  %v1033_v62 = vmax.f32 %v1001_v56, 0.0 }
 0x21d   : > { %v1034_v61 = vmax.f32 %v1002_v58, 0.0 }
 0x21e   : > { %v1035_v63 = vmax.f32 %v1003_v59, 0.0  ;;  %v846_v1 = vpop.f32.mrb[20].mxu0 }
 0x21f   : > { %v960_v2 = vadd.f32 %v3703_v28, %v846_v1  ;;  %v848_v3 = vpop.f32.mrb[21].mxu0  ;;  %v1056_v4 = vpack.c.bf16 %v1034_v61, %v1032_v60  ;;  %v2854_v1 = vld [vmem:[#allocation11 + $0x20] ss:$8 sps:$4 sm:$0xff]  }
 0x220   : > { %v961_v5 = vadd.f32 %v3706_v29, %v848_v3  ;;  %v850_v6 = vpop.f32.mrb[22].mxu0  ;;  %v1057_v7 = vpack.c.bf16 %v1035_v63, %v1033_v62  ;;  %v2865_v3 = vld [vmem:[#allocation11 + $0x54] ss:$8 sps:$4 sm:$0xff]  }
 0x221   : > { %v1004_v8 = vadd.f32 %v3709_v30, %v960_v2  ;;  %v962_v9 = vadd.f32 %v3703_v28, %v850_v6  ;;  %v852_v10 = vpop.f32.mrb[23].mxu0  ;;  %v2860_v2 = vld [vmem:[#allocation11 + $0x40] ss:$8 sps:$4 sm:$0xff]  }
 0x222   : > { %v1005_v11 = vadd.f32 %v3712_v32, %v961_v5  ;;  %v963_v12 = vadd.f32 %v3706_v29, %v852_v10  ;;  %1340 = vmatprep.mubr.bf16.mxu1 %v1057_v7  ;;  %v2868_v5 = vld [vmem:[#allocation11 + $0x64] ss:$8 sps:$4 sm:$0xff]   ;;  %v2866_v6 = vld [vmem:[#allocation11 + $0x60] ss:$8 sps:$4 sm:$0xff]   ;;  %v2871_v7 = vld [vmem:[#allocation11 + $0x74] ss:$8 sps:$4 sm:$0xff]  }
 0x223   : > { %v1006_v14 = vadd.f32 %v3709_v30, %v962_v9  ;;  %1341 = vmatmul.mubr.bf16.gmra.mrb[20].mxu1 %v1056_v4  ;;  %v1036_v16 = vmax.f32 %v1004_v8, 0.0  ;;  %v2863_v4 = vld [vmem:[#allocation11 + $0x50] ss:$8 sps:$4 sm:$0xff]   ;;  %v2874_v9 = vld [vmem:[%s4344_s8 + $0x4] ss:$8 sps:$4 sm:$0xff]  }
 0x224   : > { %v1007_v15 = vadd.f32 %v3712_v32, %v963_v12  ;;  %v1037_v19 = vmax.f32 %v1005_v11, 0.0  ;;  %v2869_v8 = vld [vmem:[#allocation11 + $0x70] ss:$8 sps:$4 sm:$0xff]  }
 0x225   : > { %v1038_v17 = vmax.f32 %v1006_v14, 0.0  ;;  %v1096_v10 = vld [vmem:[%s4345_s7] sm:$0x3] }
 0x226   : > { %v1039_v20 = vmax.f32 %v1007_v15, 0.0  ;;  %v856_v21 = vpop.f32.mrb[24].mxu0  ;;  %v3786_v11 = vrot.slane %v1096_v10, %v3695_v25  ;;  %v3789_v12 = vrot.slane %v1096_v10, %v3700_v27 }
 0x227   : > { %v964_v22 = vadd.f32 %v3703_v28, %v856_v21  ;;  %v858_v18 = vpop.f32.mrb[25].mxu0  ;;  %v1058_v23 = vpack.c.bf16 %v1038_v17, %v1036_v16 }
 0x228   : > { %v965_v24 = vadd.f32 %v3706_v29, %v858_v18  ;;  %v860_v26 = vpop.f32.mrb[26].mxu0  ;;  %v1059_v31 = vpack.c.bf16 %v1039_v20, %v1037_v19 }
 0x229   : > { %v1008_v33 = vadd.f32 %v3709_v30, %v964_v22  ;;  %v966_v34 = vadd.f32 %v3703_v28, %v860_v26  ;;  %v862_v35 = vpop.f32.mrb[27].mxu0 }
 0x22a   : > { %v1009_v36 = vadd.f32 %v3712_v32, %v965_v24  ;;  %v967_v37 = vadd.f32 %v3706_v29, %v862_v35  ;;  %1350 = vmatprep.mubr.bf16.mxu1 %v1059_v31 }
 0x22b   : > { %v1010_v38 = vadd.f32 %v3709_v30, %v966_v34  ;;  %1351 = vmatmul.mubr.bf16.gmra.mrb[24].mxu1 %v1058_v23  ;;  %v1040_v40 = vmax.f32 %v1008_v33, 0.0 }
 0x22c   : > { %v1011_v39 = vadd.f32 %v3712_v32, %v967_v37  ;;  %v1041_v42 = vmax.f32 %v1009_v36, 0.0 }
 0x22d   : > { %v1042_v41 = vmax.f32 %v1010_v38, 0.0 }
 0x22e   : > { %v1043_v43 = vmax.f32 %v1011_v39, 0.0  ;;  %v866_v44 = vpop.f32.mrb[28].mxu0 }
 0x22f   : > { %v968_v45 = vadd.f32 %v3703_v28, %v866_v44  ;;  %v868_v46 = vpop.f32.mrb[29].mxu0  ;;  %v1060_v47 = vpack.c.bf16 %v1042_v41, %v1040_v40 }
 0x230   : > { %v969_v48 = vadd.f32 %v3706_v29, %v868_v46  ;;  %v870_v49 = vpop.f32.mrb[30].mxu0  ;;  %v1061_v50 = vpack.c.bf16 %v1043_v43, %v1041_v42 }
 0x231   : > { %v1012_v51 = vadd.f32 %v3709_v30, %v968_v45  ;;  %v970_v52 = vadd.f32 %v3703_v28, %v870_v49  ;;  %v872_v53 = vpop.f32.mrb[31].mxu0  ;;  %v2856_v28 = vld [vmem:[#allocation11 + $0x24] ss:$8 sps:$4 sm:$0xff]  }
 0x232   : > { %v1013_v54 = vadd.f32 %v3712_v32, %v969_v48  ;;  %v971_v55 = vadd.f32 %v3706_v29, %v872_v53  ;;  %1360 = vmatprep.mubr.bf16.mxu1 %v1061_v50  ;;  %1569 = vmatprep.subr.bf16.mxu0 %v2856_v28  ;;  %v2859_v29 = vld [vmem:[#allocation11 + $0x34] ss:$8 sps:$4 sm:$0xff]  }
 0x233   : > { %v1014_v56 = vadd.f32 %v3709_v30, %v970_v52  ;;  %1361 = vmatmul.mubr.bf16.gmra.mrb[28].mxu1 %v1060_v47  ;;  %v1044_v58 = vmax.f32 %v1012_v51, 0.0  ;;  %2643 = vmatprep.subr.bf16.mxu1 %v2856_v28  ;;  %v2857_v30 = vld [vmem:[#allocation11 + $0x30] ss:$8 sps:$4 sm:$0xff]  }
 0x234   : > { %v1015_v57 = vadd.f32 %v3712_v32, %v971_v55  ;;  %v1045_v60 = vmax.f32 %v1013_v54, 0.0  ;;  %1570 = vmatpush1.bf16.msra.mxu0 %v2854_v1  ;;  %2651 = vmatpush1.bf16.msra.mxu1 %v2854_v1  ;;  %v2862_v32 = vld [vmem:[#allocation11 + $0x44] ss:$8 sps:$4 sm:$0xff]   ;;  %v641_v54 = vld [vmem:[%s3642_s10] sm:$0xff] }
 0x235   : > { %v1046_v59 = vmax.f32 %v1014_v56, 0.0  ;;  %1571 = vmatprep.subr.bf16.mxu0 %v2859_v29  ;;  %2644 = vmatprep.subr.bf16.mxu1 %v2859_v29 }
 0x236   : > { %v1047_v61 = vmax.f32 %v1015_v57, 0.0 }
 0x237   : > { %v1062_v62 = vpack.c.bf16 %v1046_v59, %v1044_v58 }
 0x238   : > { %v1063_v63 = vpack.c.bf16 %v1047_v61, %v1045_v60  ;;  %1572 = vmatpush1.bf16.msra.mxu0 %v2857_v30  ;;  %2652 = vmatpush1.bf16.msra.mxu1 %v2857_v30  ;;  %v642_v61 = vld [vmem:[%s3642_s10 + $0x8] sm:$0xff] }
 0x239   : > { %1573 = vmatprep.subr.bf16.mxu0 %v2862_v32  ;;  %2645 = vmatprep.subr.bf16.mxu1 %v2862_v32 }
 0x23a   : > { %1370 = vmatprep.mubr.bf16.mxu1 %v1063_v63 }
 0x23b   : > { %1371 = vmatmul.mubr.bf16.gmra.mrb[32].mxu1 %v1062_v62 }
 0x23c   : > { %1637 = vmatprep.mubr.bf16.mxu1 %v3266_v0  ;;  %1574 = vmatpush1.bf16.msra.mxu0 %v2860_v2 }
 0x23d   : > { %2653 = vmatpush1.bf16.msra.mxu1 %v2860_v2  ;;  %1575 = vmatprep.subr.bf16.mxu0 %v2865_v3 }
 0x23e   : > { %2646 = vmatprep.subr.bf16.mxu1 %v2865_v3 }
 0x240   : > { %1576 = vmatpush1.bf16.msra.mxu0 %v2863_v4 }
 0x241   : > { %2654 = vmatpush1.bf16.msra.mxu1 %v2863_v4  ;;  %1577 = vmatprep.subr.bf16.mxu0 %v2868_v5 }
 0x242   : > { %2647 = vmatprep.subr.bf16.mxu1 %v2868_v5 }
 0x244   : > { %1578 = vmatpush1.bf16.msra.mxu0 %v2866_v6 }
 0x245   : > { %2655 = vmatpush1.bf16.msra.mxu1 %v2866_v6  ;;  %1579 = vmatprep.subr.bf16.mxu0 %v2871_v7 }
 0x246   : > { %2648 = vmatprep.subr.bf16.mxu1 %v2871_v7 }
 0x248   : > { %1580 = vmatpush1.bf16.msra.mxu0 %v2869_v8 }
 0x249   : > { %2656 = vmatpush1.bf16.msra.mxu1 %v2869_v8 }
 0x24a   : > { %1690 = vmatprep.subr.bf16.mxu1 %v2874_v9 }
 0x2d6   : > { %v1302_v14 = vpop.f32.mrb[4].mxu1 }
 0x2d7   : > { %v3792_v15 = vadd.f32 %v1302_v14, %v3786_v11  ;;  %v1304_v16 = vpop.f32.mrb[5].mxu1 }
 0x2d8   : > { %v1305_v17 = vadd.f32 %v1304_v16, %v3789_v12  ;;  %v1306_v19 = vpop.f32.mrb[6].mxu1 }
 0x2d9   : > { %v2159_v20 = vmul.f32 %v3792_v15, %v3792_v15  ;;  %v1307_v21 = vadd.f32 %v1306_v19, %v3786_v11  ;;  %v1308_v22 = vpop.f32.mrb[7].mxu1 }
 0x2da   : > { %v1381_v18 = vmul.f32 0.5, %v1305_v17  ;;  %v2143_v23 = vadd.f32 1.0, %v1305_v17  ;;  %v1309_v24 = vadd.f32 %v1308_v22, %v3789_v12 }
 0x2db   : > { %v2160_v26 = vmul.f32 %v1307_v21, %v1307_v21 }
 0x2dc   : > { %v1397_v31 = vmul.f32 1.442695, %v1381_v18  ;;  %v2175_v33 = vsub.f32 %v2143_v23, %v2159_v20  ;;  %v1382_v34 = vmul.f32 0.5, %v1309_v24  ;;  %v2144_v35 = vadd.f32 1.0, %v1309_v24 }
 0x2de   : > { %2891 = vpow2.f32 %v1397_v31  ;;  %v1399_v36 = vmul.f32 1.442695, %v1382_v34  ;;  %v2176_v37 = vsub.f32 %v2144_v35, %v2160_v26  ;;  %v1312_v38 = vpop.f32.mrb[8].mxu1  ;;  %v643_v26 = vld [vmem:[%s3642_s10 + $0x10] sm:$0xff] }
 0x2df   : > { %v3800_v39 = vadd.f32 %v1312_v38, %v3786_v11  ;;  %v1314_v40 = vpop.f32.mrb[9].mxu1 }
 0x2e0   : > { %2893 = vpow2.f32 %v1399_v36  ;;  %v1315_v41 = vadd.f32 %v1314_v40, %v3789_v12  ;;  %v1316_v42 = vpop.f32.mrb[10].mxu1 }
 0x2e1   : > { %v3805_v43 = vmul.f32 %v3800_v39, %v3800_v39  ;;  %v3808_v44 = vadd.f32 %v1316_v42, %v3786_v11  ;;  %v1318_v45 = vpop.f32.mrb[11].mxu1 }
 0x2e2   : > { %v1383_v46 = vmul.f32 0.5, %v1315_v41  ;;  %v3810_v47 = vadd.f32 1.0, %v1315_v41  ;;  %v1319_v48 = vadd.f32 %v1318_v45, %v3789_v12 }
 0x2e3   : > { %v3815_v49 = vmul.f32 %v3808_v44, %v3808_v44 }
 0x2e4   : > { %v1401_v50 = vmul.f32 1.442695, %v1383_v46  ;;  %v2177_v51 = vsub.f32 %v3810_v47, %v3805_v43  ;;  %v1384_v52 = vmul.f32 0.5, %v1319_v48  ;;  %v3819_v53 = vadd.f32 1.0, %v1319_v48 }
 0x2e6   : > { %2895 = vpow2.f32 %v1401_v50  ;;  %v1403_v55 = vmul.f32 1.442695, %v1384_v52  ;;  %v2178_v56 = vsub.f32 %v3819_v53, %v3815_v49  ;;  %v1322_v57 = vpop.f32.mrb[12].mxu1 }
 0x2e7   : > { %v3825_v58 = vadd.f32 %v1322_v57, %v3786_v11  ;;  %v1324_v59 = vpop.f32.mrb[13].mxu1 }
 0x2e8   : > { %v2892_v60 = vpop.eup %2891  ;;  %2897 = vpow2.f32 %v1403_v55  ;;  %v1325_v62 = vadd.f32 %v1324_v59, %v3789_v12  ;;  %v1326_v63 = vpop.f32.mrb[14].mxu1 }
 0x2e9   : > { %v1429_v28 = vmul.f32 %v2892_v60, %v641_v54  ;;  %v2127_v1 = vmul.f32 %v2892_v60, %v2892_v60  ;;  %v3831_v29 = vmul.f32 %v3825_v58, %v3825_v58  ;;  %v3834_v30 = vadd.f32 %v1326_v63, %v3786_v11  ;;  %v1328_v32 = vpop.f32.mrb[15].mxu1 }
 0x2ea   : > { %v2894_v2 = vpop.eup %2893  ;;  %v1385_v3 = vmul.f32 0.5, %v1325_v62  ;;  %v3836_v4 = vadd.f32 1.0, %v1325_v62  ;;  %v1329_v5 = vadd.f32 %v1328_v32, %v3789_v12 }
 0x2eb   : > { %v2191_v6 = vsub.f32 %v2175_v33, %v2127_v1  ;;  %v1430_v7 = vmul.f32 %v2894_v2, %v642_v61  ;;  %v2128_v8 = vmul.f32 %v2894_v2, %v2894_v2  ;;  %v3841_v9 = vmul.f32 %v3834_v30, %v3834_v30 }
 0x2ec   : > { %v1405_v10 = vmul.f32 1.442695, %v1385_v3  ;;  %v2179_v14 = vsub.f32 %v3836_v4, %v3831_v29  ;;  %v1386_v16 = vmul.f32 0.5, %v1329_v5  ;;  %v3845_v17 = vadd.f32 1.0, %v1329_v5  ;;  %v645_v3 = vld [vmem:[%s3642_s10 + $0x20] sm:$0xff] }
 0x2ed   : > { %v2192_v19 = vsub.f32 %v2176_v37, %v2128_v8  ;;  %v1445_v20 = vadd.f32 %v1429_v28, %v3792_v15  ;;  %v1446_v22 = vadd.f32 %v1430_v7, %v1307_v21  ;;  %v644_v15 = vld [vmem:[%s3642_s10 + $0x18] sm:$0xff] }
 0x2ee   : > { %2899 = vpow2.f32 %v1405_v10  ;;  %v1407_v18 = vmul.f32 1.442695, %v1386_v16  ;;  %v2180_v23 = vsub.f32 %v3845_v17, %v3841_v9  ;;  %v1332_v24 = vpop.f32.mrb[16].mxu1 }
 0x2ef   : > { %v2233_v31 = vadd.f32 %v2192_v19, %v2191_v6  ;;  %v3852_v33 = vadd.f32 %v1332_v24, %v3786_v11  ;;  %v1334_v34 = vpop.f32.mrb[17].mxu1  ;;  %v1461_v35 = vpack.c.bf16 %v1446_v22, %v1445_v20 }
 0x2f0   : > { %v2896_v36 = vpop.eup %2895  ;;  %2901 = vpow2.f32 %v1407_v18  ;;  %v1335_v37 = vadd.f32 %v1334_v34, %v3789_v12  ;;  %v1336_v38 = vpop.f32.mrb[18].mxu1 }
 0x2f1   : > { %v2129_v21 = vmul.f32 %v2896_v36, %v2896_v36  ;;  %v3858_v40 = vmul.f32 %v3852_v33, %v3852_v33  ;;  %v3861_v41 = vadd.f32 %v1336_v38, %v3786_v11  ;;  %v1338_v42 = vpop.f32.mrb[19].mxu1  ;;  %1598 = vmatmul.mubr.bf16.vlgmr.msra.gmra.mrb[32].mxu0 %v1461_v35  ;;  %v1431_v43 = vmul.f32 %v2896_v36, %v643_v26 }
 0x2f2   : > { %v2898_v45 = vpop.eup %2897  ;;  %v1387_v46 = vmul.f32 0.5, %v1335_v37  ;;  %v3863_v47 = vadd.f32 1.0, %v1335_v37  ;;  %v1339_v48 = vadd.f32 %v1338_v42, %v3789_v12  ;;  %1607 = vmatprep.mubr.bf16.mxu0 %v3266_v0 }
 0x2f3   : > { %v2193_v50 = vsub.f32 %v2177_v51, %v2129_v21  ;;  %v2130_v52 = vmul.f32 %v2898_v45, %v2898_v45  ;;  %v3869_v54 = vmul.f32 %v3861_v41, %v3861_v41  ;;  %v1432_v55 = vmul.f32 %v2898_v45, %v644_v15 }
 0x2f4   : > { %v1409_v57 = vmul.f32 1.442695, %v1387_v46  ;;  %v2181_v59 = vsub.f32 %v3863_v47, %v3858_v40  ;;  %v1388_v60 = vmul.f32 0.5, %v1339_v48  ;;  %v3873_v61 = vadd.f32 1.0, %v1339_v48  ;;  %v647_v48 = vld [vmem:[%s3642_s10 + $0x30] sm:$0xff] }
 0x2f5   : > { %v2234_v62 = vadd.f32 %v2233_v31, %v2193_v50  ;;  %v2194_v63 = vsub.f32 %v2178_v56, %v2130_v52  ;;  %v1447_v51 = vadd.f32 %v1431_v43, %v3800_v39  ;;  %v1448_v28 = vadd.f32 %v1432_v55, %v3808_v44  ;;  %v646_v56 = vld [vmem:[%s3642_s10 + $0x28] sm:$0xff] }
 0x2f6   : > { %2903 = vpow2.f32 %v1409_v57  ;;  %v1411_v1 = vmul.f32 1.442695, %v1388_v60  ;;  %v2182_v32 = vsub.f32 %v3873_v61, %v3869_v54  ;;  %v1342_v2 = vpop.f32.mrb[20].mxu1  ;;  %v650_v54 = vld [vmem:[%s3642_s10 + $0x48] sm:$0xff] }
 0x2f7   : > { %v2235_v5 = vadd.f32 %v2234_v62, %v2194_v63  ;;  %v3884_v6 = vadd.f32 %v1342_v2, %v3786_v11  ;;  %v1344_v7 = vpop.f32.mrb[21].mxu1  ;;  %v1462_v8 = vpack.c.bf16 %v1448_v28, %v1447_v51 }
 0x2f8   : > { %v2900_v49 = vpop.eup %2899  ;;  %2905 = vpow2.f32 %v1411_v1  ;;  %v1345_v53 = vadd.f32 %v1344_v7, %v3789_v12  ;;  %v1346_v39 = vpop.f32.mrb[22].mxu1 }
 0x2f9   : > { %v2131_v44 = vmul.f32 %v2900_v49, %v2900_v49  ;;  %v3890_v10 = vmul.f32 %v3884_v6, %v3884_v6  ;;  %v3893_v16 = vadd.f32 %v1346_v39, %v3786_v11  ;;  %v1348_v19 = vpop.f32.mrb[23].mxu1  ;;  %1608 = vmatmul.mubr.bf16.gmra.mrb[36].mxu0 %v1462_v8  ;;  %v1433_v20 = vmul.f32 %v2900_v49, %v645_v3 }
 0x2fa   : > { %v2902_v22 = vpop.eup %2901  ;;  %v1389_v18 = vmul.f32 0.5, %v1345_v53  ;;  %v3895_v24 = vadd.f32 1.0, %v1345_v53  ;;  %v1349_v26 = vadd.f32 %v1348_v19, %v3789_v12  ;;  %1617 = vmatprep.mubr.bf16.mxu0 %v3266_v0 }
 0x2fb   : > { %v2195_v31 = vsub.f32 %v2179_v14, %v2131_v44  ;;  %v2132_v34 = vmul.f32 %v2902_v22, %v2902_v22  ;;  %v3904_v35 = vmul.f32 %v3893_v16, %v3893_v16  ;;  %v1434_v36 = vmul.f32 %v2902_v22, %v646_v56 }
 0x2fc   : > { %v1413_v37 = vmul.f32 1.442695, %v1389_v18  ;;  %v2183_v38 = vsub.f32 %v3895_v24, %v3890_v10  ;;  %v1390_v15 = vmul.f32 0.5, %v1349_v26  ;;  %v3908_v21 = vadd.f32 1.0, %v1349_v26 }
 0x2fd   : > { %v2236_v42 = vadd.f32 %v2235_v5, %v2195_v31  ;;  %v2196_v29 = vsub.f32 %v2180_v23, %v2132_v34  ;;  %v1449_v4 = vadd.f32 %v1433_v20, %v3825_v58  ;;  %v1450_v14 = vadd.f32 %v1434_v36, %v3834_v30  ;;  %v648_v23 = vld [vmem:[%s3642_s10 + $0x38] sm:$0xff]  ;;  %v649_v20 = vld [vmem:[%s3642_s10 + $0x40] sm:$0xff] }
 0x2fe   : > { %2907 = vpow2.f32 %v1413_v37  ;;  %v1415_v43 = vmul.f32 1.442695, %v1390_v15  ;;  %v2184_v45 = vsub.f32 %v3908_v21, %v3904_v35  ;;  %v1352_v46 = vpop.f32.mrb[24].mxu1 }
 0x2ff   : > { %v2237_v50 = vadd.f32 %v2236_v42, %v2196_v29  ;;  %v3919_v52 = vadd.f32 %v1352_v46, %v3786_v11  ;;  %v1354_v55 = vpop.f32.mrb[25].mxu1  ;;  %v1463_v57 = vpack.c.bf16 %v1450_v14, %v1449_v4 }
 0x300   : > { %v2904_v9 = vpop.eup %2903  ;;  %2909 = vpow2.f32 %v1415_v43  ;;  %v1355_v17 = vadd.f32 %v1354_v55, %v3789_v12  ;;  %v1356_v58 = vpop.f32.mrb[26].mxu1 }
 0x301   : > { %v2133_v30 = vmul.f32 %v2904_v9, %v2904_v9  ;;  %v3925_v60 = vmul.f32 %v3919_v52, %v3919_v52  ;;  %v3928_v62 = vadd.f32 %v1356_v58, %v3786_v11  ;;  %v1358_v63 = vpop.f32.mrb[27].mxu1  ;;  %1618 = vmatmul.mubr.bf16.gmra.mrb[40].mxu0 %v1463_v57  ;;  %v1435_v51 = vmul.f32 %v2904_v9, %v647_v48 }
 0x302   : > { %v2906_v28 = vpop.eup %2905  ;;  %v1391_v1 = vmul.f32 0.5, %v1355_v17  ;;  %v3930_v2 = vadd.f32 1.0, %v1355_v17  ;;  %v1359_v3 = vadd.f32 %v1358_v63, %v3789_v12  ;;  %1627 = vmatprep.mubr.bf16.mxu0 %v3266_v0 }
 0x303   : > { %v2197_v5 = vsub.f32 %v2181_v59, %v2133_v30  ;;  %v2134_v7 = vmul.f32 %v2906_v28, %v2906_v28  ;;  %v3939_v8 = vmul.f32 %v3928_v62, %v3928_v62  ;;  %v1436_v49 = vmul.f32 %v2906_v28, %v648_v23 }
 0x304   : > { %v1417_v53 = vmul.f32 1.442695, %v1391_v1  ;;  %v2185_v39 = vsub.f32 %v3930_v2, %v3925_v60  ;;  %v1392_v56 = vmul.f32 0.5, %v1359_v3  ;;  %v3943_v44 = vadd.f32 1.0, %v1359_v3  ;;  %v2872_v3 = vld [vmem:[%s4344_s8] ss:$8 sps:$4 sm:$0xff]  }
 0x305   : > { %v2238_v19 = vadd.f32 %v2237_v50, %v2197_v5  ;;  %v2198_v40 = vsub.f32 %v2182_v32, %v2134_v7  ;;  %v1451_v47 = vadd.f32 %v1435_v51, %v3852_v33  ;;  %v1452_v59 = vadd.f32 %v1436_v49, %v3861_v41  ;;  %v651_v5 = vld [vmem:[%s3642_s10 + $0x50] sm:$0xff] }
 0x306   : > { %2911 = vpow2.f32 %v1417_v53  ;;  %v1419_v22 = vmul.f32 1.442695, %v1392_v56  ;;  %v2186_v18 = vsub.f32 %v3943_v44, %v3939_v8  ;;  %v1362_v26 = vpop.f32.mrb[28].mxu1  ;;  %v652_v53 = vld [vmem:[%s3642_s10 + $0x58] sm:$0xff] }
 0x307   : > { %v2239_v31 = vadd.f32 %v2238_v19, %v2198_v40  ;;  %v3954_v34 = vadd.f32 %v1362_v26, %v3786_v11  ;;  %v1364_v36 = vpop.f32.mrb[29].mxu1  ;;  %v1464_v37 = vpack.c.bf16 %v1452_v59, %v1451_v47 }
 0x308   : > { %v2908_v15 = vpop.eup %2907  ;;  %2913 = vpow2.f32 %v1419_v22  ;;  %v1365_v33 = vadd.f32 %v1364_v36, %v3789_v12  ;;  %v1366_v61 = vpop.f32.mrb[30].mxu1 }
 0x309   : > { %v1437_v41 = vmul.f32 %v2908_v15, %v649_v20  ;;  %v2135_v32 = vmul.f32 %v2908_v15, %v2908_v15  ;;  %v3960_v42 = vmul.f32 %v3954_v34, %v3954_v34  ;;  %v3963_v29 = vadd.f32 %v1366_v61, %v3786_v11  ;;  %v1368_v4 = vpop.f32.mrb[31].mxu1  ;;  %1628 = vmatmul.mubr.bf16.gmra.mrb[44].mxu0 %v1464_v37 }
 0x30a   : > { %v2910_v14 = vpop.eup %2909  ;;  %v1393_v43 = vmul.f32 0.5, %v1365_v33  ;;  %v3965_v46 = vadd.f32 1.0, %v1365_v33  ;;  %v1369_v48 = vadd.f32 %v1368_v4, %v3789_v12 }
 0x30b   : > { %v2199_v50 = vsub.f32 %v2183_v38, %v2135_v32  ;;  %v1438_v55 = vmul.f32 %v2910_v14, %v650_v54  ;;  %v2136_v57 = vmul.f32 %v2910_v14, %v2910_v14  ;;  %v3973_v9 = vmul.f32 %v3963_v29, %v3963_v29 }
 0x30c   : > { %v1421_v17 = vmul.f32 1.442695, %v1393_v43  ;;  %v2187_v58 = vsub.f32 %v3965_v46, %v3960_v42  ;;  %v1394_v23 = vmul.f32 0.5, %v1369_v48  ;;  %v3977_v30 = vadd.f32 1.0, %v1369_v48  ;;  %v654_v48 = vld [vmem:[%s3642_s10 + $0x68] sm:$0xff] }
 0x30d   : > { %v2240_v63 = vadd.f32 %v2239_v31, %v2199_v50  ;;  %v2200_v10 = vsub.f32 %v2184_v45, %v2136_v57  ;;  %v1453_v24 = vadd.f32 %v1437_v41, %v3884_v6  ;;  %v1454_v38 = vadd.f32 %v1438_v55, %v3893_v16 }
 0x30e   : > { %2915 = vpow2.f32 %v1421_v17  ;;  %v1423_v51 = vmul.f32 1.442695, %v1394_v23  ;;  %v2188_v28 = vsub.f32 %v3977_v30, %v3973_v9  ;;  %v1372_v1 = vpop.f32.mrb[32].mxu1  ;;  %v655_v23 = vld [vmem:[%s3642_s10 + $0x70] sm:$0xff] }
 0x30f   : > { %v2241_v7 = vadd.f32 %v2240_v63, %v2200_v10  ;;  %v3991_v35 = vadd.f32 %v1372_v1, %v3786_v11  ;;  %v1374_v21 = vpop.f32.mrb[33].mxu1  ;;  %v1465_v6 = vpack.c.bf16 %v1454_v38, %v1453_v24  ;;  %v656_v24 = vld [vmem:[%s3642_s10 + $0x78] sm:$0xff] }
 0x310   : > { %v2912_v45 = vpop.eup %2911  ;;  %2917 = vpow2.f32 %v1423_v51  ;;  %v1375_v16 = vadd.f32 %v1374_v21, %v3789_v12  ;;  %v1376_v49 = vpop.f32.mrb[34].mxu1 }
 0x311   : > { %v2137_v56 = vmul.f32 %v2912_v45, %v2912_v45  ;;  %v2173_v19 = vmul.f32 %v3991_v35, %v3991_v35  ;;  %v1377_v40 = vadd.f32 %v1376_v49, %v3786_v11  ;;  %v1378_v47 = vpop.f32.mrb[35].mxu1  ;;  %1638 = vmatmul.mubr.bf16.vlgmr.msra.gmra.mrb[36].mxu1 %v1465_v6  ;;  %v1439_v59 = vmul.f32 %v2912_v45, %v651_v5  ;;  %v2875_v45 = vld [vmem:[#allocation13 + $0x40] sm:$0xff]   ;;  %v2877_v49 = vld [vmem:[#allocation13 + $0x48] sm:$0xff]  }
 0x312   : > { %v2914_v20 = vpop.eup %2913  ;;  %v1395_v22 = vmul.f32 0.5, %v1375_v16  ;;  %v2157_v26 = vadd.f32 1.0, %v1375_v16  ;;  %v1379_v31 = vadd.f32 %v1378_v47, %v3789_v12  ;;  %1691 = vmatpush1.bf16.msra.mxu1 %v2872_v3  ;;  %1647 = vmatprep.mubr.bf16.mxu1 %v3266_v0  ;;  %v2876_v16 = vld [vmem:[#allocation13] sm:$0xff]  }
 0x313   : > { %v2201_v36 = vsub.f32 %v2185_v39, %v2137_v56  ;;  %v2138_v37 = vmul.f32 %v2914_v20, %v2914_v20  ;;  %v2174_v15 = vmul.f32 %v1377_v40, %v1377_v40  ;;  %v1440_v54 = vmul.f32 %v2914_v20, %v652_v53  ;;  %v653_v39 = vld [vmem:[%s3642_s10 + $0x60] sm:$0xff]  ;;  %2577 = vmatprep.subr.bf16.mxu0 %v2875_v45  ;;  %v2884_v47 = vld [vmem:[#allocation13 + $0x20] sm:$0xff]  }
 0x314   : > { %v1425_v11 = vmul.f32 1.442695, %v1395_v22  ;;  %v2189_v33 = vsub.f32 %v2157_v26, %v2173_v19  ;;  %v1396_v61 = vmul.f32 0.5, %v1379_v31  ;;  %v2158_v41 = vadd.f32 1.0, %v1379_v31  ;;  %2578 = vmatpush3.bf16.msra.mxu0 %v2876_v16  ;;  %v2879_v53 = vld [vmem:[#allocation13 + $0x50] sm:$0xff]   ;;  %v2881_v19 = vld [vmem:[#allocation13 + $0x58] sm:$0xff]  }
 0x315   : > { %v2242_v32 = vadd.f32 %v2241_v7, %v2201_v36  ;;  %v2202_v12 = vsub.f32 %v2186_v18, %v2138_v37  ;;  %v1455_v42 = vadd.f32 %v1439_v59, %v3919_v52  ;;  %v1456_v4 = vadd.f32 %v1440_v54, %v3928_v62  ;;  %2579 = vmatprep.subr.bf16.mxu0 %v2877_v49  ;;  %v2880_v56 = vld [vmem:[#allocation13 + $0x10] sm:$0xff]   ;;  %v2886_v59 = vld [vmem:[#allocation13 + $0x28] sm:$0xff]   ;;  %v2889_v26 = vld [vmem:[#allocation13 + $0x78] sm:$0xff]  }
 0x316   : > { %2919 = vpow2.f32 %v1425_v11  ;;  %v1427_v60 = vmul.f32 1.442695, %v1396_v61  ;;  %v2190_v2 = vsub.f32 %v2158_v41, %v2174_v15  ;;  %v2887_v20 = vld [vmem:[#allocation13 + $0x70] sm:$0xff]   ;;  %v2890_v31 = vld [vmem:[#allocation13 + $0x38] sm:$0xff]  }
 0x317   : > { %v2243_v14 = vadd.f32 %v2242_v32, %v2202_v12  ;;  %v1466_v43 = vpack.c.bf16 %v1456_v4, %v1455_v42  ;;  %v2888_v22 = vld [vmem:[#allocation13 + $0x30] sm:$0xff]  }
 0x318   : > { %v2916_v46 = vpop.eup %2915  ;;  %2921 = vpow2.f32 %v1427_v60 }
 0x319   : > { %v2139_v50 = vmul.f32 %v2916_v46, %v2916_v46  ;;  %1648 = vmatmul.mubr.bf16.gmra.mrb[40].mxu1 %v1466_v43  ;;  %v1441_v55 = vmul.f32 %v2916_v46, %v653_v39 }
 0x31a   : > { %v2918_v8 = vpop.eup %2917  ;;  %1657 = vmatprep.mubr.bf16.mxu1 %v3266_v0 }
 0x31b   : > { %v2203_v52 = vsub.f32 %v2187_v58, %v2139_v50  ;;  %v2140_v44 = vmul.f32 %v2918_v8, %v2918_v8  ;;  %v1442_v62 = vmul.f32 %v2918_v8, %v654_v48  ;;  %v1457_v18 = vadd.f32 %v1441_v55, %v3954_v34 }
 0x31d   : > { %v2204_v57 = vsub.f32 %v2188_v28, %v2140_v44  ;;  %v1458_v9 = vadd.f32 %v1442_v62, %v3963_v29  ;;  %v2244_v17 = vadd.f32 %v2243_v14, %v2203_v52 }
 0x31f   : > { %v1467_v30 = vpack.c.bf16 %v1458_v9, %v1457_v18  ;;  %v2245_v63 = vadd.f32 %v2244_v17, %v2204_v57 }
 0x320   : > { %v2920_v10 = vpop.eup %2919 }
 0x321   : > { %1658 = vmatmul.mubr.bf16.gmra.mrb[44].mxu1 %v1467_v30  ;;  %v1443_v38 = vmul.f32 %v2920_v10, %v655_v23  ;;  %v2141_v51 = vmul.f32 %v2920_v10, %v2920_v10  ;;  %v1771_v10 = vld [vmem:[%s4346_s20] sm:$0x3]  ;;  %s3145_s20 = scalar_lea.vmem %s3144_s12, 32 }
 0x322   : > { %v2922_v1 = vpop.eup %2921  ;;  %1667 = vmatprep.mubr.bf16.mxu1 %v3266_v0  ;;  %p3147_p4 = scmp.lt.s32.totalorder %s3145_s20, %s3139_s21 }
 0x323   : > { %v1444_v58 = vmul.f32 %v2922_v1, %v656_v24  ;;  %v1459_v3 = vadd.f32 %v1443_v38, %v3991_v35  ;;  %v2142_v5 = vmul.f32 %v2922_v1, %v2922_v1  ;;  %v2205_v34 = vsub.f32 %v2189_v33, %v2141_v51  ;;  %v2878_v35 = vld [vmem:[#allocation13 + $0x8] sm:$0xff]  }
 0x324   : > { %2580 = vmatpush3.bf16.msra.mxu0 %v2878_v35  ;;  %v4067_v1 = vrot.slane %v1771_v10, %v3695_v25  ;;  %p3148_p8 = por %p3147_p4, %p3146_p9 }
 0x325   : > { %v1460_v28 = vadd.f32 %v1444_v58, %v1377_v40  ;;  %v2206_v7 = vsub.f32 %v2190_v2, %v2142_v5  ;;  %v2246_v29 = vadd.f32 %v2245_v63, %v2205_v34  ;;  %2581 = vmatprep.subr.bf16.mxu0 %v2879_v53  ;;  %v2882_v40 = vld [vmem:[#allocation13 + $0x18] sm:$0xff]   ;;  %v4073_v5 = vrot.slane %v1771_v10, %v3700_v27 }
 0x326   : > { %p3149_p11 = pnand %p3148_p8, %p3142_p5 }
 0x327   : > { %v1468_v21 = vpack.c.bf16 %v1460_v28, %v1459_v3  ;;  %v4017_v6 = vadd.f32 %v2246_v29, %v2206_v7 }
 0x328   : > { %2582 = vmatpush3.bf16.msra.mxu0 %v2880_v56 }
 0x329   : > { %1668 = vmatmul.mubr.bf16.gmra.mrb[48].mxu1 %v1468_v21  ;;  %2583 = vmatprep.subr.bf16.mxu0 %v2881_v19 }
 0x32a   : > { %1722 = vmatprep.mubr.bf16.mxu1 %v3266_v0  ;;  %v2883_v0 = vld [vmem:[#allocation13 + $0x60] sm:$0xff]  }
 0x32c   : > { %2584 = vmatpush3.bf16.msra.mxu0 %v2882_v40 }
 0x32d   : > { %2585 = vmatprep.subr.bf16.mxu0 %v2883_v0 }
 0x330   : > { %2586 = vmatpush3.bf16.msra.mxu0 %v2884_v47 }
 0x331   : > { %2553 = vmatmul.mubr.msk.bf16.vlgmr.msra.gmra.mrb[52].mxu1 %vm887_vm0, %v3667_v13  ;;  %v2885_v13 = vld [vmem:[#allocation13 + $0x68] sm:$0xff]  }
 0x332   : > { %2587 = vmatprep.subr.bf16.mxu0 %v2885_v13 }
 0x334   : > { %2588 = vmatpush3.bf16.msra.mxu0 %v2886_v59 }
 0x335   : > { %2589 = vmatprep.subr.bf16.mxu0 %v2887_v20 }
 0x338   : > { %2590 = vmatpush3.bf16.msra.mxu0 %v2888_v22 }
 0x339   : > { %2591 = vmatprep.subr.bf16.mxu0 %v2889_v26 }
 0x33c   : > { %2592 = vmatpush3.bf16.msra.mxu0 %v2890_v31 }
 0x3c4   : > { %v1599_v36 = vpop.f32.mrb[32].mxu0 }
 0x3c5   : > { %v1601_v37 = vpop.f32.mrb[33].mxu0 }
 0x3c6   : > { %v1603_v15 = vpop.f32.mrb[34].mxu0 }
 0x3c7   : > { %v1605_v54 = vpop.f32.mrb[35].mxu0 }
 0x3cc   : > { %v1609_v11 = vpop.f32.mrb[36].mxu0 }
 0x3cd   : > { %v1611_v33 = vpop.f32.mrb[37].mxu0 }
 0x3ce   : > { %v1613_v61 = vpop.f32.mrb[38].mxu0 }
 0x3cf   : > { %v1615_v41 = vpop.f32.mrb[39].mxu0 }
 0x3d4   : > { %v4022_v32 = vpop.f32.mrb[40].mxu0 }
 0x3d5   : > { %v1621_v12 = vpop.f32.mrb[41].mxu0 }
 0x3d6   : > { %v1623_v42 = vpop.f32.mrb[42].mxu0 }
 0x3d7   : > { %v1625_v4 = vpop.f32.mrb[43].mxu0 }
 0x3dc   : > { %v4024_v60 = vpop.f32.mrb[44].mxu0 }
 0x3dd   : > { %v1631_v2 = vpop.f32.mrb[45].mxu0 }
 0x3de   : > { %v4026_v39 = vpop.f32.mrb[46].mxu0 }
 0x3df   : > { %v1635_v14 = vpop.f32.mrb[47].mxu0 }
 0x3e4   : > { %v4028_v43 = vpop.f32.mrb[36].mxu1 }
 0x3e5   : > { %v4030_v46 = vpop.f32.mrb[37].mxu1 }
 0x3e6   : > { %v4032_v48 = vpop.f32.mrb[38].mxu1 }
 0x3e7   : > { %v4034_v50 = vpop.f32.mrb[39].mxu1 }
 0x3ec   : > { %v4036_v55 = vpop.f32.mrb[40].mxu1 }
 0x3ed   : > { %v4038_v8 = vpop.f32.mrb[41].mxu1 }
 0x3ee   : > { %v4040_v52 = vpop.f32.mrb[42].mxu1 }
 0x3ef   : > { %v4042_v44 = vpop.f32.mrb[43].mxu1 }
 0x3f4   : > { %v4044_v62 = vpop.f32.mrb[44].mxu1 }
 0x3f5   : > { %v4046_v18 = vpop.f32.mrb[45].mxu1 }
 0x3f6   : > { %v4048_v57 = vpop.f32.mrb[46].mxu1 }
 0x3f7   : > { %v4050_v9 = vpop.f32.mrb[47].mxu1 }
 0x3fc   : > { %v4052_v17 = vpop.f32.mrb[48].mxu1 }
 0x3fd   : > { %v4054_v23 = vpop.f32.mrb[49].mxu1 }
 0x3fe   : > { %v4056_v30 = vpop.f32.mrb[50].mxu1 }
 0x3ff   : > { %v4058_v63 = vpop.f32.mrb[51].mxu1 }
 0x404   : > { %v1724_v24 = vpop.f32.mrb[52].mxu1 }
 0x405   : > { %v4064_v38 = vrot.slane %v1724_v24, %v3695_v25  ;;  %v1726_v51 = vpop.f32.mrb[53].mxu1 }
 0x406   : > { %v4070_v58 = vrot.slane %v1726_v51, %v3695_v25  ;;  %v1728_v3 = vpop.f32.mrb[54].mxu1 }
 0x407   : > { %v1729_v34 = vpop.f32.mrb[55].mxu1  ;;  %v1739_v28 = vadd.f32 %v4064_v38, %v1599_v36  ;;  %v1741_v7 = vadd.f32 %v4064_v38, %v1603_v15  ;;  %v1743_v29 = vadd.f32 %v4064_v38, %v1609_v11  ;;  %v1745_v21 = vadd.f32 %v4064_v38, %v1613_v61 }
 0x408   : > { %v1740_v45 = vadd.f32 %v4070_v58, %v1601_v37  ;;  %v1742_v16 = vadd.f32 %v4070_v58, %v1605_v54  ;;  %v1744_v25 = vadd.f32 %v4070_v58, %v1611_v33  ;;  %v1746_v49 = vadd.f32 %v4070_v58, %v1615_v41 }
 0x409   : > { %v1783_v27 = vadd.f32 %v4067_v1, %v1739_v28  ;;  %v1785_v35 = vadd.f32 %v4067_v1, %v1741_v7  ;;  %v1787_v53 = vadd.f32 %v4067_v1, %v1743_v29  ;;  %v1789_v56 = vadd.f32 %v4067_v1, %v1745_v21 }
 0x40a   : > { %v1784_v19 = vadd.f32 %v4073_v5, %v1740_v45  ;;  %v1786_v40 = vadd.f32 %v4073_v5, %v1742_v16  ;;  %v1788_v0 = vadd.f32 %v4073_v5, %v1744_v25  ;;  %v1790_v47 = vadd.f32 %v4073_v5, %v1746_v49 }
 0x40b   : > { %v1815_v13 = vmax.f32 %v1783_v27, 0.0  ;;  %v1817_v59 = vmax.f32 %v1785_v35, 0.0  ;;  %v1819_v20 = vmax.f32 %v1787_v53, 0.0  ;;  %v1821_v22 = vmax.f32 %v1789_v56, 0.0 }
 0x40c   : > { %v1816_v26 = vmax.f32 %v1784_v19, 0.0  ;;  %v1818_v31 = vmax.f32 %v1786_v40, 0.0  ;;  %v1820_v36 = vmax.f32 %v1788_v0, 0.0  ;;  %v1822_v37 = vmax.f32 %v1790_v47, 0.0 }
 0x40d   : > { %v1847_v15 = vpack.c.bf16 %v1817_v59, %v1815_v13  ;;  %v1849_v54 = vpack.c.bf16 %v1821_v22, %v1819_v20  ;;  %v1748_v11 = vadd.f32 %v4070_v58, %v1621_v12  ;;  %v1750_v33 = vadd.f32 %v4070_v58, %v1625_v4 }
 0x40e   : > { %v1848_v61 = vpack.c.bf16 %v1818_v31, %v1816_v26  ;;  %v1850_v41 = vpack.c.bf16 %v1822_v37, %v1820_v36  ;;  %v1747_v10 = vadd.f32 %v4064_v38, %v4022_v32  ;;  %v1749_v24 = vadd.f32 %v4064_v38, %v1623_v42 }
 0x40f   : > { %v1792_v51 = vadd.f32 %v4073_v5, %v1748_v11  ;;  %v1794_v3 = vadd.f32 %v4073_v5, %v1750_v33  ;;  %v1752_v34 = vadd.f32 %v4070_v58, %v1631_v2  ;;  %v1754_v28 = vadd.f32 %v4070_v58, %v1635_v14 }
 0x410   : > { %2030 = vmatprep.mubr.bf16.mxu0 %v1848_v61  ;;  %v1791_v12 = vadd.f32 %v4067_v1, %v1747_v10  ;;  %v1793_v4 = vadd.f32 %v4067_v1, %v1749_v24  ;;  %v1751_v7 = vadd.f32 %v4064_v38, %v4024_v60  ;;  %v1753_v32 = vadd.f32 %v4064_v38, %v4026_v39 }
 0x411   : > { %2031 = vmatmul.mubr.bf16.vlgmr.msra.gmra.mrb[48].mxu0 %v1847_v15  ;;  %v1824_v42 = vmax.f32 %v1792_v51, 0.0  ;;  %v1826_v29 = vmax.f32 %v1794_v3, 0.0  ;;  %v1796_v21 = vadd.f32 %v4073_v5, %v1752_v34  ;;  %v1798_v2 = vadd.f32 %v4073_v5, %v1754_v28 }
 0x412   : > { %2038 = vmatprep.mubr.bf16.mxu0 %v1850_v41  ;;  %v1823_v14 = vmax.f32 %v1791_v12, 0.0  ;;  %v1825_v45 = vmax.f32 %v1793_v4, 0.0  ;;  %v1795_v16 = vadd.f32 %v4067_v1, %v1751_v7  ;;  %v1797_v25 = vadd.f32 %v4067_v1, %v1753_v32 }
 0x413   : > { %v1852_v49 = vpack.c.bf16 %v1826_v29, %v1824_v42  ;;  %v1828_v27 = vmax.f32 %v1796_v21, 0.0  ;;  %v1830_v60 = vmax.f32 %v1798_v2, 0.0  ;;  %v1756_v39 = vadd.f32 %v4070_v58, %v4030_v46 }
 0x414   : > { %v1851_v35 = vpack.c.bf16 %v1825_v45, %v1823_v14  ;;  %v1827_v53 = vmax.f32 %v1795_v16, 0.0  ;;  %v1829_v56 = vmax.f32 %v1797_v25, 0.0  ;;  %v1758_v19 = vadd.f32 %v4070_v58, %v4034_v50 }
 0x415   : > { %v1854_v40 = vpack.c.bf16 %v1830_v60, %v1828_v27  ;;  %v1800_v0 = vadd.f32 %v4073_v5, %v1756_v39  ;;  %v1755_v47 = vadd.f32 %v4064_v38, %v4028_v43  ;;  %v1757_v13 = vadd.f32 %v4064_v38, %v4032_v48 }
 0x416   : > { %v1853_v59 = vpack.c.bf16 %v1829_v56, %v1827_v53  ;;  %v1802_v20 = vadd.f32 %v4073_v5, %v1758_v19  ;;  %v1760_v46 = vadd.f32 %v4070_v58, %v4038_v8  ;;  %v1762_v22 = vadd.f32 %v4070_v58, %v4042_v44 }
 0x417   : > { %v1832_v26 = vmax.f32 %v1800_v0, 0.0  ;;  %v1799_v50 = vadd.f32 %v4067_v1, %v1755_v47  ;;  %v1801_v31 = vadd.f32 %v4067_v1, %v1757_v13  ;;  %v1759_v43 = vadd.f32 %v4064_v38, %v4036_v55  ;;  %v2923_v0 = vld [vmem:[%s3635_s28] sm:$0xff] }
 0x418   : > { %v1834_v36 = vmax.f32 %v1802_v20, 0.0  ;;  %v1804_v48 = vadd.f32 %v4073_v5, %v1760_v46  ;;  %v1806_v37 = vadd.f32 %v4073_v5, %v1762_v22  ;;  %v1761_v15 = vadd.f32 %v4064_v38, %v4040_v52 }
 0x419   : > { %2039 = vmatmul.mubr.bf16.gmra.mrb[52].mxu0 %v1849_v54  ;;  %v1831_v8 = vmax.f32 %v1799_v50, 0.0  ;;  %v1833_v11 = vmax.f32 %v1801_v31, 0.0  ;;  %v1803_v44 = vadd.f32 %v4067_v1, %v1759_v43  ;;  %v1764_v33 = vadd.f32 %v4070_v58, %v4046_v18 }
 0x41a   : > { %2046 = vmatprep.mubr.bf16.mxu0 %v1852_v49  ;;  %v1856_v61 = vpack.c.bf16 %v1834_v36, %v1832_v26  ;;  %v1836_v41 = vmax.f32 %v1804_v48, 0.0  ;;  %v1838_v55 = vmax.f32 %v1806_v37, 0.0  ;;  %v1805_v10 = vadd.f32 %v4067_v1, %v1761_v15 }
 0x41b   : > { %v1855_v24 = vpack.c.bf16 %v1833_v11, %v1831_v8  ;;  %v1835_v51 = vmax.f32 %v1803_v44, 0.0  ;;  %v1766_v3 = vadd.f32 %v4070_v58, %v4050_v9  ;;  %v1808_v52 = vadd.f32 %v4073_v5, %v1764_v33  ;;  %v2925_v8 = vld [vmem:[%s3635_s28 + $0x10] sm:$0xff] }
 0x41c   : > { %v1858_v54 = vpack.c.bf16 %v1838_v55, %v1836_v41  ;;  %v1837_v34 = vmax.f32 %v1805_v10, 0.0  ;;  %v1763_v28 = vadd.f32 %v4064_v38, %v4044_v62  ;;  %v1765_v18 = vadd.f32 %v4064_v38, %v4048_v57 }
 0x41d   : > { %v1810_v12 = vadd.f32 %v4073_v5, %v1766_v3  ;;  %v1840_v4 = vmax.f32 %v1808_v52, 0.0  ;;  %v1768_v7 = vadd.f32 %v4070_v58, %v4054_v23  ;;  %v1770_v32 = vadd.f32 %v4070_v58, %v4058_v63 }
 0x41e   : > { %v1857_v9 = vpack.c.bf16 %v1837_v34, %v1835_v51  ;;  %v1807_v42 = vadd.f32 %v4067_v1, %v1763_v28  ;;  %v1809_v29 = vadd.f32 %v4067_v1, %v1765_v18  ;;  %v1767_v62 = vadd.f32 %v4064_v38, %v4052_v17 }
 0x41f   : > { %v1842_v21 = vmax.f32 %v1810_v12, 0.0  ;;  %v1812_v57 = vadd.f32 %v4073_v5, %v1768_v7  ;;  %v1814_v2 = vadd.f32 %v4073_v5, %v1770_v32  ;;  %v1769_v14 = vadd.f32 %v4064_v38, %v4056_v30  ;;  %v4161_v38 = vld [vmem:[%s4347_s6] ss:$0 sm:$0xff] }
 0x420   : > { %v1839_v23 = vmax.f32 %v1807_v42, 0.0  ;;  %v1841_v45 = vmax.f32 %v1809_v29, 0.0  ;;  %v1811_v63 = vadd.f32 %v4067_v1, %v1767_v62  ;;  %v2927_v12 = vld [vmem:[%s3635_s28 + $0x20] sm:$0xff] }
 0x421   : > { %2047 = vmatmul.mubr.bf16.gmra.mrb[56].mxu0 %v1851_v35  ;;  %v1860_v58 = vpack.c.bf16 %v1842_v21, %v1840_v4  ;;  %v1844_v16 = vmax.f32 %v1812_v57, 0.0  ;;  %v1846_v25 = vmax.f32 %v1814_v2, 0.0  ;;  %v1813_v49 = vadd.f32 %v4067_v1, %v1769_v14 }
 0x422   : > { %2054 = vmatprep.mubr.bf16.mxu0 %v1854_v40  ;;  %v1859_v17 = vpack.c.bf16 %v1841_v45, %v1839_v23  ;;  %v1843_v27 = vmax.f32 %v1811_v63, 0.0 }
 0x423   : > { %v1862_v60 = vpack.c.bf16 %v1846_v25, %v1844_v16  ;;  %v1845_v39 = vmax.f32 %v1813_v49, 0.0  ;;  %v2929_v16 = vld [vmem:[%s3635_s28 + $0x30] sm:$0xff] }
 0x425   : > { %v1861_v53 = vpack.c.bf16 %v1845_v39, %v1843_v27  ;;  %v2930_v27 = vld [vmem:[%s3635_s28 + $0x38] sm:$0xff] }
 0x429   : > { %2055 = vmatmul.mubr.bf16.gmra.mrb[60].mxu0 %v1853_v59  ;;  %v2924_v59 = vld [vmem:[%s3635_s28 + $0x8] sm:$0xff] }
 0x42a   : > { %2062 = vmatprep.mubr.bf16.mxu0 %v1856_v61  ;;  %v2926_v61 = vld [vmem:[%s3635_s28 + $0x18] sm:$0xff] }
 0x431   : > { %2063 = vmatmul.mubr.bf16.gmra.mrb[64].mxu0 %v1855_v24 }
 0x432   : > { %2070 = vmatprep.mubr.bf16.mxu0 %v1858_v54 }
 0x439   : > { %2071 = vmatmul.mubr.bf16.gmra.mrb[68].mxu0 %v1857_v9  ;;  %v2928_v9 = vld [vmem:[%s3635_s28 + $0x28] sm:$0xff] }
 0x43a   : > { %2078 = vmatprep.mubr.bf16.mxu0 %v1860_v58 }
 0x441   : > { %2079 = vmatmul.mubr.bf16.gmra.mrb[72].mxu0 %v1859_v17 }
 0x442   : > { %2086 = vmatprep.mubr.bf16.mxu0 %v1862_v60 }
 0x449   : > { %2087 = vmatmul.mubr.bf16.gmra.mrb[76].mxu0 %v1861_v53 }
 0x4e4   : > { %v2593_v30 = vpop.f32.mrb[48].mxu0 }
 0x4e5   : > { %v2594_v1 = vpop.f32.mrb[49].mxu0 }
 0x4e6   : > { %v2595_v5 = vadd.f32 %v2594_v1, %v2593_v30  ;;  %v2596_v35 = vpop.f32.mrb[50].mxu0 }
 0x4e7   : > { %v2597_v56 = vpop.f32.mrb[51].mxu0 }
 0x4e8   : > { %v2033_v19 = vadd.f32 %v2595_v5, %v4161_v38  ;;  %v2598_v40 = vadd.f32 %v2597_v56, %v2596_v35 }
 0x4ea   : > { %v2095_v47 = vsub.f32 %v2033_v19, %v2923_v0  ;;  %v2036_v13 = vadd.f32 %v2598_v40, %v4161_v38 }
 0x4ec   : > { %v2096_v20 = vsub.f32 %v2036_v13, %v2924_v59  ;;  %v2599_v46 = vpop.f32.mrb[52].mxu0  ;;  %v2111_v26 = vmul.f32 %v2095_v47, %v2095_v47  ;;  %v2931_v47 = vld [vmem:[%s3635_s28 + $0x40] sm:$0xff] }
 0x4ed   : > { %v2600_v22 = vpop.f32.mrb[53].mxu0 }
 0x4ee   : > { %v2112_v50 = vmul.f32 %v2096_v20, %v2096_v20  ;;  %v2601_v31 = vadd.f32 %v2600_v22, %v2599_v46  ;;  %v2602_v43 = vpop.f32.mrb[54].mxu0  ;;  %v2932_v46 = vld [vmem:[%s3635_s28 + $0x48] sm:$0xff] }
 0x4ef   : > { %v2603_v36 = vpop.f32.mrb[55].mxu0 }
 0x4f0   : > { %v2207_v48 = vadd.f32 %v2112_v50, %v2111_v26  ;;  %v2041_v37 = vadd.f32 %v2601_v31, %v4161_v38  ;;  %v2604_v15 = vadd.f32 %v2603_v36, %v2602_v43 }
 0x4f2   : > { %v2097_v11 = vsub.f32 %v2041_v37, %v2925_v8  ;;  %v2044_v44 = vadd.f32 %v2604_v15, %v4161_v38 }
 0x4f4   : > { %v2113_v33 = vmul.f32 %v2097_v11, %v2097_v11  ;;  %v2098_v41 = vsub.f32 %v2044_v44, %v2926_v61  ;;  %v2605_v55 = vpop.f32.mrb[56].mxu0  ;;  %v2933_v44 = vld [vmem:[%s3635_s28 + $0x50] sm:$0xff] }
 0x4f5   : > { %v2606_v10 = vpop.f32.mrb[57].mxu0 }
 0x4f6   : > { %v2208_v24 = vadd.f32 %v2207_v48, %v2113_v33  ;;  %v2114_v51 = vmul.f32 %v2098_v41, %v2098_v41  ;;  %v2607_v3 = vadd.f32 %v2606_v10, %v2605_v55  ;;  %v2608_v52 = vpop.f32.mrb[58].mxu0  ;;  %v2934_v55 = vld [vmem:[%s3635_s28 + $0x58] sm:$0xff] }
 0x4f7   : > { %v2609_v54 = vpop.f32.mrb[59].mxu0 }
 0x4f8   : > { %v2209_v34 = vadd.f32 %v2208_v24, %v2114_v51  ;;  %v2049_v28 = vadd.f32 %v2607_v3, %v4161_v38  ;;  %v2610_v18 = vadd.f32 %v2609_v54, %v2608_v52 }
 0x4fa   : > { %v2099_v4 = vsub.f32 %v2049_v28, %v2927_v12  ;;  %v2052_v7 = vadd.f32 %v2610_v18, %v4161_v38 }
 0x4fc   : > { %v2115_v32 = vmul.f32 %v2099_v4, %v2099_v4  ;;  %v2100_v42 = vsub.f32 %v2052_v7, %v2928_v9  ;;  %v2611_v29 = vpop.f32.mrb[60].mxu0  ;;  %v2935_v7 = vld [vmem:[%s3635_s28 + $0x60] sm:$0xff] }
 0x4fd   : > { %v2612_v62 = vpop.f32.mrb[61].mxu0 }
 0x4fe   : > { %v2210_v21 = vadd.f32 %v2209_v34, %v2115_v32  ;;  %v2116_v57 = vmul.f32 %v2100_v42, %v2100_v42  ;;  %v2613_v2 = vadd.f32 %v2612_v62, %v2611_v29  ;;  %v2614_v14 = vpop.f32.mrb[62].mxu0  ;;  %v2936_v29 = vld [vmem:[%s3635_s28 + $0x68] sm:$0xff] }
 0x4ff   : > { %v2615_v23 = vpop.f32.mrb[63].mxu0 }
 0x500   : > { %v2211_v45 = vadd.f32 %v2210_v21, %v2116_v57  ;;  %v2057_v63 = vadd.f32 %v2613_v2, %v4161_v38  ;;  %v2616_v58 = vadd.f32 %v2615_v23, %v2614_v14 }
 0x502   : > { %v2101_v25 = vsub.f32 %v2057_v63, %v2929_v16  ;;  %v2060_v49 = vadd.f32 %v2616_v58, %v4161_v38 }
 0x504   : > { %v2117_v17 = vmul.f32 %v2101_v25, %v2101_v25  ;;  %v2102_v60 = vsub.f32 %v2060_v49, %v2930_v27  ;;  %v2617_v39 = vpop.f32.mrb[64].mxu0 }
 0x505   : > { %v2618_v53 = vpop.f32.mrb[65].mxu0 }
 0x506   : > { %v2212_v30 = vadd.f32 %v2211_v45, %v2117_v17  ;;  %v2118_v1 = vmul.f32 %v2102_v60, %v2102_v60  ;;  %v2619_v5 = vadd.f32 %v2618_v53, %v2617_v39  ;;  %v2620_v35 = vpop.f32.mrb[66].mxu0  ;;  %v2937_v17 = vld [vmem:[%s3635_s28 + $0x70] sm:$0xff]  ;;  %v2938_v60 = vld [vmem:[%s3635_s28 + $0x78] sm:$0xff]  ;;  %s2571_s28 = sshll.u32 %s3365_s19, 4 }
 0x507   : > { %v2621_v56 = vpop.f32.mrb[67].mxu0  ;;  %s4206_s25 = scalar_lea.hbm %s4348_s22, %s2571_s28 }
 0x508   : > { %v2213_v19 = vadd.f32 %v2212_v30, %v2118_v1  ;;  %v2065_v40 = vadd.f32 %v2619_v5, %v4161_v38  ;;  %v2622_v0 = vadd.f32 %v2621_v56, %v2620_v35 }
 0x50a   : > { %v2103_v13 = vsub.f32 %v2065_v40, %v2931_v47  ;;  %v2068_v59 = vadd.f32 %v2622_v0, %v4161_v38 }
 0x50c   : > { %v2119_v20 = vmul.f32 %v2103_v13, %v2103_v13  ;;  %v2104_v22 = vsub.f32 %v2068_v59, %v2932_v46  ;;  %v2623_v26 = vpop.f32.mrb[68].mxu0 }
 0x50d   : > { %v2624_v50 = vpop.f32.mrb[69].mxu0 }
 0x50e   : > { %v2214_v31 = vadd.f32 %v2213_v19, %v2119_v20  ;;  %v2120_v43 = vmul.f32 %v2104_v22, %v2104_v22  ;;  %v2625_v36 = vadd.f32 %v2624_v50, %v2623_v26  ;;  %v2626_v48 = vpop.f32.mrb[70].mxu0 }
 0x50f   : > { %v2627_v37 = vpop.f32.mrb[71].mxu0 }
 0x510   : > { %v2215_v15 = vadd.f32 %v2214_v31, %v2120_v43  ;;  %v2073_v8 = vadd.f32 %v2625_v36, %v4161_v38  ;;  %v2628_v11 = vadd.f32 %v2627_v37, %v2626_v48 }
 0x512   : > { %v2105_v33 = vsub.f32 %v2073_v8, %v2933_v44  ;;  %v2076_v61 = vadd.f32 %v2628_v11, %v4161_v38 }
 0x514   : > { %v2121_v41 = vmul.f32 %v2105_v33, %v2105_v33  ;;  %v2106_v10 = vsub.f32 %v2076_v61, %v2934_v55  ;;  %v2629_v24 = vpop.f32.mrb[72].mxu0 }
 0x515   : > { %v2630_v51 = vpop.f32.mrb[73].mxu0 }
 0x516   : > { %v2216_v3 = vadd.f32 %v2215_v15, %v2121_v41  ;;  %v2122_v52 = vmul.f32 %v2106_v10, %v2106_v10  ;;  %v2631_v54 = vadd.f32 %v2630_v51, %v2629_v24  ;;  %v2632_v34 = vpop.f32.mrb[74].mxu0 }
 0x517   : > { %v2633_v28 = vpop.f32.mrb[75].mxu0 }
 0x518   : > { %v2217_v18 = vadd.f32 %v2216_v3, %v2122_v52  ;;  %v2081_v12 = vadd.f32 %v2631_v54, %v4161_v38  ;;  %v2634_v4 = vadd.f32 %v2633_v28, %v2632_v34 }
 0x51a   : > { %v2107_v32 = vsub.f32 %v2081_v12, %v2935_v7  ;;  %v2084_v9 = vadd.f32 %v2634_v4, %v4161_v38 }
 0x51c   : > { %v2123_v42 = vmul.f32 %v2107_v32, %v2107_v32  ;;  %v2108_v62 = vsub.f32 %v2084_v9, %v2936_v29  ;;  %v2635_v21 = vpop.f32.mrb[76].mxu0 }
 0x51d   : > { %v2636_v57 = vpop.f32.mrb[77].mxu0 }
 0x51e   : > { %v2124_v2 = vmul.f32 %v2108_v62, %v2108_v62  ;;  %v2637_v14 = vadd.f32 %v2636_v57, %v2635_v21  ;;  %v2638_v23 = vpop.f32.mrb[78].mxu0  ;;  %v2218_v45 = vadd.f32 %v2217_v18, %v2123_v42 }
 0x51f   : > { %v2639_v63 = vpop.f32.mrb[79].mxu0 }
 0x520   : > { %v2089_v58 = vadd.f32 %v2637_v14, %v4161_v38  ;;  %v2640_v16 = vadd.f32 %v2639_v63, %v2638_v23  ;;  %v2219_v25 = vadd.f32 %v2218_v45, %v2124_v2 }
 0x522   : > { %v2092_v49 = vadd.f32 %v2640_v16, %v4161_v38  ;;  %v2109_v27 = vsub.f32 %v2089_v58, %v2937_v17 }
 0x524   : > { %v2110_v39 = vsub.f32 %v2092_v49, %v2938_v60  ;;  %v2125_v53 = vmul.f32 %v2109_v27, %v2109_v27 }
 0x526   : > { %v2126_v30 = vmul.f32 %v2110_v39, %v2110_v39  ;;  %v2220_v1 = vadd.f32 %v2219_v25, %v2125_v53 }
 0x528   : > { %v2221_v5 = vadd.f32 %v2220_v1, %v2126_v30 }
 0x52a   : > { %2222 = vadd.xlane.f32.xlu0 %v2221_v5 }
 0x52e   : > { %2248 = vadd.xlane.f32.xlu0 %v4017_v6 }
 0x5b7   : > { %v2223_v35 = vpop.xlane.xlu0 %2222 }
 0x5b8   : > { %v2224_v56 = vrot.slane %v2223_v35, 4 }
 0x5ba   : > { %v2225_v19 = vadd.f32 %v2224_v56, %v2223_v35 }
 0x5bb   : > { %v2249_v40 = vpop.xlane.xlu0 %2248 }
 0x5bc   : > { %v2226_v0 = vrot.slane %v2225_v19, 2  ;;  %v2250_v38 = vrot.slane %v2249_v40, 4 }
 0x5be   : > { %v2251_v47 = vadd.f32 %v2250_v38, %v2249_v40  ;;  %v2227_v13 = vadd.f32 %v2226_v0, %v2225_v19 }
 0x5c0   : > { %v2252_v59 = vrot.slane %v2251_v47, 2  ;;  %v2228_v20 = vrot.slane %v2227_v13, 1 }
 0x5c2   : > { %v2253_v46 = vadd.f32 %v2252_v59, %v2251_v47  ;;  %v2229_v22 = vadd.f32 %v2228_v20, %v2227_v13 }
 0x5c4   : > { %2657 = vpush %v2229_v22  ;;  %v2254_v6 = vrot.slane %v2253_v46, 1 }
 0x5c6   : > { %v2255_v26 = vadd.f32 %v2254_v6, %v2253_v46 }
 0x5c8   : > { %2659 = vpush %v2255_v26 }
 0x5f5   : > { %s2658_s7 = spop %2657 }
 0x5f6   : > { %v2231_v50 = vstv %s2658_s7 }
 0x5f7   : > { %2232 = vst [vmem:[%s611_s11] sm:$0x1] %v2231_v50 }
 0x5f8   : > { %3152 = shalt.err (!%p3149_p11)
}
 0x5f9   : > { %s3153_s10 = scalar_lea.hbm %s4206_s25, 16  ;;  %s3157_s11 = scalar_lea.hbm %s4348_s22, 32 }
 0x5fa   : > { %p3154_p3 = scmp.ne.s32.totalorder %s4206_s25, %s3153_s10  ;;  %p3158_p13 = scmp.lt.u32.totalorder %s4206_s25, %s4348_s22 }
 0x5fb   : > { %p3159_p0 = scmp.lt.u32.totalorder %s3157_s11, %s3153_s10  ;;  %p3161_p2 = scmp.lt.u32.totalorder %s3153_s10, %s4206_s25 }
 0x5fc   : > { %p3155_p12 = pnand %p3154_p3, %p4349_p6 }
 0x5fd   : > { %p3160_p7 = por %p3159_p0, %p3158_p13 }
 0x5fe   : > { %p3156_p1 = pneg %p3155_p12 }
 0x5ff   : > { %p3162_p10 = por %p3161_p2, %p3160_p7 }
 0x601   : > { %p3163_p5 = pnand %p3162_p10, %p3156_p1 }
 0x603   : > { %3166 = shalt.err (!%p3163_p5)
}
 0x604   : > { %2685 = dma.vmem_to_hbm [thread:$0]  (%p4349_p6), %s4208_s18, 16, %s4206_s25, %s2260_s0  }
 0x605   : > { %s2660_s7 = spop %2659  ;;  %s4350_s12 = sld [smem:[#allocation36_spill]] }
 0x606   : > { %v2257_v31 = vstv %s2660_s7  ;;  %s2264_s10 = scalar_lea.sflag [#allocation16], %s3631_s17  ;;  %s3167_s23 = scalar_lea.vmem %s4210_s26, 16 }
 0x607   : > { %2258 = vst [vmem:[%s617_s3] sm:$0x1] %v2257_v31  ;;  %p3168_p9 = scmp.ne.s32.totalorder %s4210_s26, %s3167_s23  ;;  %s3268_s6 = smov [#allocation15]  }
 0x608   : > { %s3171_s11 = sshll.u32 %s3268_s6, 4  ;;  %s3172_s11 = int_to_ptr.vmem [resolvable:$false] %s3171_s11 }
 0x609   : > { %p3169_p4 = pnand %p3168_p9, %p4349_p6  ;;  %s3173_s18 = scalar_lea.vmem %s3172_s11, 32 }
 0x60a   : > { %p3174_p11 = scmp.lt.s32.totalorder %s4210_s26, %s3172_s11  ;;  %p3175_p3 = scmp.lt.s32.totalorder %s3173_s18, %s3167_s23 }
 0x60b   : > { %s4239_s20 = scalar_lea.hbm %s4350_s12, %s2571_s28  ;;  %p3170_p8 = pneg %p3169_p4 }
 0x60c   : > { %p3176_p12 = por %p3175_p3, %p3174_p11 }
 0x60e   : > { %p3177_p1 = pnand %p3176_p12, %p3170_p8 }
 0x610   : > { %3180 = shalt.err (!%p3177_p1)
}
 0x611   : > { %s3181_s19 = scalar_lea.hbm %s4239_s20, 16  ;;  %s3185_s3 = scalar_lea.hbm %s4350_s12, 32 }
 0x612   : > { %p3182_p13 = scmp.ne.s32.totalorder %s4239_s20, %s3181_s19  ;;  %p3186_p2 = scmp.lt.u32.totalorder %s4239_s20, %s4350_s12 }
 0x613   : > { %p3187_p10 = scmp.lt.u32.totalorder %s3185_s3, %s3181_s19  ;;  %p3189_p9 = scmp.lt.u32.totalorder %s3181_s19, %s4239_s20 }
 0x614   : > { %p3183_p0 = pnand %p3182_p13, %p4349_p6 }
 0x615   : > { %p3188_p5 = por %p3187_p10, %p3186_p2 }
 0x616   : > { %p3184_p7 = pneg %p3183_p0 }
 0x617   : > { %p3190_p4 = por %p3189_p9, %p3188_p5 }
 0x619   : > { %p3191_p8 = pnand %p3190_p4, %p3184_p7 }
 0x61b   : > { %3194 = shalt.err (!%p3191_p8)
}
 0x61c   : > { %2686 = dma.vmem_to_hbm [thread:$0]  (%p4349_p6), %s4210_s26, 16, %s4239_s20, %s2264_s10  }
 0x61d PF: > { %s2301_s4 = sand.u32 1, %s3241_s29   ;;  %p4351_p11 = scmp.ne.s32.totalorder %s4332_s14, 0 }
 0x61e   : > { %p4352_p3 = scmp.ge.s32.totalorder %s3253_s16, 2  ;;  %s2302_s24 = scalar_lea.sflag [#allocation4], %s2301_s4 }
 0x620   : > { %p2713_p12 = pnand %p4352_p3, %p4351_p11 }
 0x622   : > { %3232 = dma.done.wait (!%p2713_p12), %s2302_s24, 16  }
 0x623   : > { %3234 = vsyncadd (!%p2713_p12), %s2302_s24, 4294967280  ;;  %s2310_s7 = scalar_lea.sflag [#allocation16], %s2301_s4 }
 0x624   : > { %3236 = dma.done.wait (!%p2713_p12), %s2310_s7, 16  }
 0x625   : > { %3238 = vsyncadd (!%p2713_p12), %s2310_s7, 4294967280  ;;  %s4353_s27 = sld [smem:[#allocation24_spill]]  ;;  %p36_p6 = scmp.ge.s32.totalorder %s3514_s9, 4  }
 0x626   : > { %s4354_s29 = smov %s3245_s30  ;;  %s4355_s30 = smov %s3249_s15 }
 0x627   : > { %s4357_s16 = smov %s3514_s9  ;;  %38 = sbr.rel (!%p36_p6) target bundleno = 24 (0x18), region = 170 }
 0x62b   : > { %s4356_s15 = smov %s4353_s27 }
 0x62e   :  { %2314 = vsyncpa [#allocation3], 1 }
 0x62f   :  { %2316 = vsyncpa [#allocation3 + $0x1], 1 }
 0x630   :  { %2317 = vsyncpa [#allocation6], 1 }
 0x631   :  { %2319 = vsyncpa [#allocation6 + $0x1], 1 }
 0x632   :  { %2320 = vsyncpa [#allocation9], 1 }
 0x633   :  { %2321 = vsyncpa [#allocation12], 1 }
 0x634   :  { %2322 = vsyncpa [#allocation4], 1 }
 0x635   :  { %2324 = vsyncpa [#allocation4 + $0x1], 1 }
 0x636   :  { %2325 = vsyncpa [#allocation16], 1 }
 0x637   :  { %2327 = vsyncpa [#allocation16 + $0x1], 1 }

</bundles_post_ra>
